<compile_context>
chip_gen: v7x
topology: tpu7x:2x2x1
jax: 0.10.0
libtpu: 0.0.40
codegen_flags: <defaults>
</compile_context>

<pallas_src>
import functools
import math

import jax
import jax.numpy as jnp
from jax import lax
from jax.experimental import pallas as pl
from jax.experimental.pallas import tpu as pltpu


def _pick_tile(n, preferred):
    """Largest divisor of n that is a multiple of 128 (then 16, then 8) and
    <= max(preferred, 128). Falls back to the full extent for ragged sizes."""
    cap = max(128, preferred)
    for unit in (128, 16, 8):
        t = (min(n, cap) // unit) * unit
        while t >= unit:
            if n % t == 0:
                return t
            t -= unit
    # TODO(synk): prime/ragged sequence lengths need a masked pad path.
    return n


# -----------------------------------------------------------------------------
# Fused kernel: QKV projection + flash attention (online softmax over KV tiles)
# -----------------------------------------------------------------------------
def fused_attn_kernel(xq_ref, xkv_ref, w_ref, b_ref, o_ref,
                      q_s, m_s, l_s, acc_s, *, scale, hp):
    kv_idx = pl.program_id(2)

    @pl.when(kv_idx == 0)
    def _init():
        # Project the q tile once per (b, q_tile); resident across kv steps.
        # bf16 MXU operands, f32 accumulation; 1/sqrt(H) folded in here so the
        # hot kv loop has no extra (tq, tk) VPU multiply.
        xq = xq_ref[...].astype(jnp.bfloat16)                      # (tq, F)
        q = jnp.dot(xq, w_ref[:, :hp],
                    preferred_element_type=jnp.float32) + b_ref[:, :hp]
        q_s[...] = (q * scale).astype(jnp.bfloat16)                 # (tq, Hp)
        m_s[...] = jnp.full_like(m_s, -jnp.inf)
        l_s[...] = jnp.zeros_like(l_s)
        acc_s[...] = jnp.zeros_like(acc_s)

    # K/V projection for this kv tile, recomputed from x (cheaper than reading
    # pre-computed k/v back from HBM at these head dims). Lane-aligned slices
    # (Hp is a multiple of 128).
    xkv = xkv_ref[...].astype(jnp.bfloat16)                         # (tk, F)
    kv = jnp.dot(xkv, w_ref[:, hp:],
                 preferred_element_type=jnp.float32) + b_ref[:, hp:]
    k = kv[:, :hp].astype(jnp.bfloat16)                             # (tk, Hp)
    v = kv[:, hp:].astype(jnp.bfloat16)                             # (tk, Hp)

    # Scores: contract last axes of q and k -> MXU consumes K in natural
    # layout, no XLU transpose, f32 accumulation. Scale already in q.
    s = lax.dot_general(q_s[...], k, (((1,), (1,)), ((), ())),
                        preferred_element_type=jnp.float32)         # (tq, tk)

    # Online softmax statistics, all in f32.
    m_prev = m_s[...]
    m_new = jnp.maximum(m_prev, jnp.max(s, axis=-1, keepdims=True))
    alpha = jnp.exp(m_prev - m_new)
    p = jnp.exp(s - m_new)                                          # (tq, tk)

    l_s[...] = alpha * l_s[...] + jnp.sum(p, axis=-1, keepdims=True)
    acc_s[...] = alpha * acc_s[...] + jnp.dot(
        p.astype(jnp.bfloat16), v, preferred_element_type=jnp.float32)
    m_s[...] = m_new

    @pl.when(kv_idx == pl.num_programs(2) - 1)
    def _finalize():
        inv_l = pl.reciprocal(l_s[...], approx=True)    # EUP slot, ~free
        o_ref[...] = (acc_s[...] * inv_l).astype(o_ref.dtype)


# -----------------------------------------------------------------------------
# Wrapper
# -----------------------------------------------------------------------------
def self_attention(x, wq, wk, wv, bq, bk, bv, *,
                   tq=256, tk=512, out_dtype=jnp.bfloat16):
    """x: (B, S, F) f32; wq/wk/wv: (F, H); bq/bk/bv: (1, H).
    Returns (B, S, H) in out_dtype (accumulation is f32 throughout)."""
    B, S, F = x.shape
    H = wq.shape[1]
    Hp = ((H + 127) // 128) * 128          # lane-dense head dim for compute
    scale = 1.0 / math.sqrt(H)             # torch uses K.size(-1) ** 0.5
    vmem_limit = 48 * 1024 * 1024          # below v7x physical, above defaults

    # ---- pack weights: pad each head block to Hp lanes, concat, cast bf16 ----
    # TODO(synk): for very large F/H where a resident (F, 3*Hp) bf16 weight no
    # longer fits VMEM (esp. v7x 64 MiB), a K-tiled two-stage path is needed.
    def pad_cols(a):
        return jnp.pad(a, ((0, 0), (0, Hp - H)))
    wqkv = jnp.concatenate(
        [pad_cols(wq), pad_cols(wk), pad_cols(wv)], axis=1).astype(jnp.bfloat16)
    bqkv = jnp.concatenate(
        [pad_cols(bq), pad_cols(bk), pad_cols(bv)], axis=1).astype(jnp.float32)

    # ---- tiles -----------------------------------------------------------------
    tq = _pick_tile(S, tq)
    tk = _pick_tile(S, tk)
    # v7x megacore: expose >= 2 blocks on the parallel axes so both TCs work.
    if B * (S // tq) < 2 and tq % 2 == 0 and (tq // 2) % 128 == 0:
        tq //= 2

    xq_spec = pl.BlockSpec((pl.Squeezed(), tq, F), lambda b, i, j: (b, i, 0))
    xkv_spec = pl.BlockSpec((pl.Squeezed(), tk, F), lambda b, i, j: (b, j, 0))
    w_spec = pl.BlockSpec((F, 3 * Hp), lambda b, i, j: (0, 0))    # resident
    b_spec = pl.BlockSpec((1, 3 * Hp), lambda b, i, j: (0, 0))    # resident
    o_spec = pl.BlockSpec((pl.Squeezed(), tq, Hp), lambda b, i, j: (b, i, 0))

    out = pl.pallas_call(
        functools.partial(fused_attn_kernel, scale=scale, hp=Hp),
        out_shape=jax.ShapeDtypeStruct((B, S, Hp), out_dtype),
        grid_spec=pltpu.PrefetchScalarGridSpec(
            num_scalar_prefetch=0,
            grid=(B, S // tq, S // tk),
            in_specs=[xq_spec, xkv_spec, w_spec, b_spec],
            out_specs=o_spec,
            scratch_shapes=[
                pltpu.VMEM((tq, Hp), jnp.bfloat16),   # projected, pre-scaled q
                pltpu.VMEM((tq, 1), jnp.float32),     # running max  m
                pltpu.VMEM((tq, 1), jnp.float32),     # running sum  l
                pltpu.VMEM((tq, Hp), jnp.float32),    # output accumulator
            ],
        ),
        compiler_params=pltpu.CompilerParams(
            dimension_semantics=("parallel", "parallel", "arbitrary"),
            vmem_limit_bytes=vmem_limit),
    )(x, x, wqkv, bqkv)

    return out[:, :, :H]   # drop the lane padding once, outside the hot loop


# -----------------------------------------------------------------------------
# Pure-JAX reference
# -----------------------------------------------------------------------------
def reference(x, wq, wk, wv, bq, bk, bv):
    q = x @ wq + bq
    k = x @ wk + bk
    v = x @ wv + bv
    s = jnp.einsum("bqd,bkd->bqk", q, k) / jnp.sqrt(jnp.float32(k.shape[-1]))
    p = jax.nn.softmax(s, axis=-1)
    return jnp.einsum("bqk,bkd->bqd", p, v)


if __name__ == "__main__":
    B, S, IN_FEATURES, HIDDEN = 2, 256, 32, 32

    key = jax.random.PRNGKey(0)
    kx, kq, kk, kv, kbq, kbk, kbv = jax.random.split(key, 7)

    x = jax.random.normal(kx, (B, S, IN_FEATURES), dtype=jnp.float32)

    # nn.Linear(in_features, hidden_dim): weight (H, F), bias (H,).
    # Stored here pre-transposed as (F, H) so y = x @ W + b.
    scale = 1.0 / math.sqrt(IN_FEATURES)
    wq = jax.random.uniform(kq, (IN_FEATURES, HIDDEN), jnp.float32, -scale, scale)
    wk = jax.random.uniform(kk, (IN_FEATURES, HIDDEN), jnp.float32, -scale, scale)
    wv = jax.random.uniform(kv, (IN_FEATURES, HIDDEN), jnp.float32, -scale, scale)
    bq = jax.random.uniform(kbq, (1, HIDDEN), jnp.float32, -scale, scale)
    bk = jax.random.uniform(kbk, (1, HIDDEN), jnp.float32, -scale, scale)
    bv = jax.random.uniform(kbv, (1, HIDDEN), jnp.float32, -scale, scale)

    # 128-wide tiles so the test exercises multiple q-tiles AND kv-tiles
    # (grid = (2, 2, 2)) and the online-softmax accumulation path.
    out = self_attention(x, wq, wk, wv, bq, bk, bv, tq=128, tk=128)
    out = jax.block_until_ready(out)

    ref = reference(x, wq, wk, wv, bq, bk, bv)
    assert out.shape == (B, S, HIDDEN)
    # bf16 MXU operands + bf16 output + approx reciprocal => loosened tolerance.
    assert jnp.allclose(out.astype(jnp.float32), ref, atol=2e-2, rtol=2e-2), \
        "mismatch vs reference"

    print("KERNEL_OK")
</pallas_src>

<mosaic_0001>
module attributes {stable_mosaic.version = 11 : i64} {
  func.func @fused_attn_kernel(%arg0: i32, %arg1: i32, %arg2: i32, %arg3: memref<1x128x32xf32, #tpu.memory_space<vmem>>, %arg4: memref<1x128x32xf32, #tpu.memory_space<vmem>>, %arg5: memref<32x384xbf16, #tpu.memory_space<vmem>>, %arg6: memref<1x384xf32, #tpu.memory_space<vmem>>, %arg7: memref<1x128x128xbf16, #tpu.memory_space<vmem>>, %arg8: memref<128x128xbf16, #tpu.memory_space<vmem>>, %arg9: memref<128x1xf32, #tpu.memory_space<vmem>>, %arg10: memref<128x1xf32, #tpu.memory_space<vmem>>, %arg11: memref<128x128xf32, #tpu.memory_space<vmem>>) attributes {dimension_semantics = [#tpu.dimension_semantics<parallel>, #tpu.dimension_semantics<parallel>, #tpu.dimension_semantics<arbitrary>], iteration_bounds = array<i64: 2, 2, 2>, scalar_prefetch = 0 : i64, scratch_operands = 4 : i64, tpu.core_type = #tpu.core_type<tc>, window_params = [{transform_indices = @transform_0, window_bounds = array<i64: 1, 128, 32>}, {transform_indices = @transform_1, window_bounds = array<i64: 1, 128, 32>}, {pipeline_mode = #tpu.pipeline_mode<synchronous>, transform_indices = @transform_2, window_bounds = array<i64: 32, 384>}, {pipeline_mode = #tpu.pipeline_mode<synchronous>, transform_indices = @transform_3, window_bounds = array<i64: 1, 384>}, {transform_indices = @transform_4, window_bounds = array<i64: 1, 128, 128>}]} {
    %c0_i32 = arith.constant 0 : i32
    %0 = arith.cmpi eq, %arg2, %c0_i32 : i32
    %1 = arith.extui %0 : i1 to i32
    %c0_i32_0 = arith.constant 0 : i32
    %2 = arith.cmpi ne, %1, %c0_i32_0 : i32
    scf.if %2 {
      %c0_25 = arith.constant 0 : index
      %c0_26 = arith.constant 0 : index
      %c0_27 = arith.constant 0 : index
      %43 = vector.load %arg3[%c0_25, %c0_26, %c0_27] : memref<1x128x32xf32, #tpu.memory_space<vmem>>, vector<1x128x32xf32>
      %44 = vector.shape_cast %43 : vector<1x128x32xf32> to vector<128x32xf32>
      %45 = arith.truncf %44 : vector<128x32xf32> to vector<128x32xbf16>
      %c0_28 = arith.constant 0 : index
      %c0_29 = arith.constant 0 : index
      %46 = vector.load %arg5[%c0_28, %c0_29] : memref<32x384xbf16, #tpu.memory_space<vmem>>, vector<32x128xbf16>
      %cst_30 = arith.constant dense<0.000000e+00> : vector<128x128xf32>
      %47 = tpu.matmul %45, %46, %cst_30 {dimension_numbers = #tpu.dot_dimension_numbers<[1], [0], [0], [1], [0, 0, 1, 1], [], []>} : vector<128x32xbf16>, vector<32x128xbf16>, vector<128x128xf32> -> vector<128x128xf32>
      %c0_31 = arith.constant 0 : index
      %c0_32 = arith.constant 0 : index
      %48 = vector.load %arg6[%c0_31, %c0_32] : memref<1x384xf32, #tpu.memory_space<vmem>>, vector<1x128xf32>
      %49 = vector.broadcast %48 : vector<1x128xf32> to vector<128x128xf32>
      %50 = arith.addf %47, %49 : vector<128x128xf32>
      %cst_33 = arith.constant 0.176776692 : f32
      %51 = vector.broadcast %cst_33 : f32 to vector<128x128xf32>
      %52 = arith.mulf %50, %51 : vector<128x128xf32>
      %53 = arith.truncf %52 : vector<128x128xf32> to vector<128x128xbf16>
      %c0_34 = arith.constant 0 : index
      %c0_35 = arith.constant 0 : index
      %54 = vector.load %arg8[%c0_34, %c0_35] : memref<128x128xbf16, #tpu.memory_space<vmem>>, vector<128x128xbf16>
      tpu.vector_store %arg8[%c0_34, %c0_35], %53 {strides = array<i32>} : memref<128x128xbf16, #tpu.memory_space<vmem>>, vector<128x128xbf16>,
      %cst_36 = arith.constant 0xFF800000 : f32
      %55 = vector.broadcast %cst_36 : f32 to vector<128x1xf32>
      %c0_37 = arith.constant 0 : index
      %c0_38 = arith.constant 0 : index
      %56 = vector.load %arg9[%c0_37, %c0_38] : memref<128x1xf32, #tpu.memory_space<vmem>>, vector<128x1xf32>
      tpu.vector_store %arg9[%c0_37, %c0_38], %55 {strides = array<i32>} : memref<128x1xf32, #tpu.memory_space<vmem>>, vector<128x1xf32>,
      %cst_39 = arith.constant 0.000000e+00 : f32
      %57 = vector.broadcast %cst_39 : f32 to vector<128x1xf32>
      %c0_40 = arith.constant 0 : index
      %c0_41 = arith.constant 0 : index
      %58 = vector.load %arg10[%c0_40, %c0_41] : memref<128x1xf32, #tpu.memory_space<vmem>>, vector<128x1xf32>
      tpu.vector_store %arg10[%c0_40, %c0_41], %57 {strides = array<i32>} : memref<128x1xf32, #tpu.memory_space<vmem>>, vector<128x1xf32>,
      %cst_42 = arith.constant 0.000000e+00 : f32
      %59 = vector.broadcast %cst_42 : f32 to vector<128x128xf32>
      %c0_43 = arith.constant 0 : index
      %c0_44 = arith.constant 0 : index
      %60 = vector.load %arg11[%c0_43, %c0_44] : memref<128x128xf32, #tpu.memory_space<vmem>>, vector<128x128xf32>
      tpu.vector_store %arg11[%c0_43, %c0_44], %59 {strides = array<i32>} : memref<128x128xf32, #tpu.memory_space<vmem>>, vector<128x128xf32>,
    } else {
    }
    %c0 = arith.constant 0 : index
    %c0_1 = arith.constant 0 : index
    %c0_2 = arith.constant 0 : index
    %3 = vector.load %arg4[%c0, %c0_1, %c0_2] : memref<1x128x32xf32, #tpu.memory_space<vmem>>, vector<1x128x32xf32>
    %4 = vector.shape_cast %3 : vector<1x128x32xf32> to vector<128x32xf32>
    %5 = arith.truncf %4 : vector<128x32xf32> to vector<128x32xbf16>
    %c0_3 = arith.constant 0 : index
    %c128 = arith.constant 128 : index
    %6 = vector.load %arg5[%c0_3, %c128] : memref<32x384xbf16, #tpu.memory_space<vmem>>, vector<32x256xbf16>
    %cst = arith.constant dense<0.000000e+00> : vector<128x256xf32>
    %7 = tpu.matmul %5, %6, %cst {dimension_numbers = #tpu.dot_dimension_numbers<[1], [0], [0], [1], [0, 0, 1, 1], [], []>} : vector<128x32xbf16>, vector<32x256xbf16>, vector<128x256xf32> -> vector<128x256xf32>
    %c0_4 = arith.constant 0 : index
    %c128_5 = arith.constant 128 : index
    %8 = vector.load %arg6[%c0_4, %c128_5] : memref<1x384xf32, #tpu.memory_space<vmem>>, vector<1x256xf32>
    %9 = vector.broadcast %8 : vector<1x256xf32> to vector<128x256xf32>
    %10 = arith.addf %7, %9 : vector<128x256xf32>
    %11 = vector.extract_strided_slice %10 {offsets = [0, 0], sizes = [128, 128], strides = [1, 1]} : vector<128x256xf32> to vector<128x128xf32>
    %12 = arith.truncf %11 : vector<128x128xf32> to vector<128x128xbf16>
    %13 = vector.extract_strided_slice %10 {offsets = [0, 128], sizes = [128, 128], strides = [1, 1]} : vector<128x256xf32> to vector<128x128xf32>
    %14 = arith.truncf %13 : vector<128x128xf32> to vector<128x128xbf16>
    %c0_6 = arith.constant 0 : index
    %c0_7 = arith.constant 0 : index
    %15 = vector.load %arg8[%c0_6, %c0_7] : memref<128x128xbf16, #tpu.memory_space<vmem>>, vector<128x128xbf16>
    %cst_8 = arith.constant dense<0.000000e+00> : vector<128x128xf32>
    %16 = tpu.matmul %15, %12, %cst_8 {dimension_numbers = #tpu.dot_dimension_numbers<[1], [1], [0], [0], [0, 0, 1, 0], [], []>} : vector<128x128xbf16>, vector<128x128xbf16>, vector<128x128xf32> -> vector<128x128xf32>
    %c0_9 = arith.constant 0 : index
    %c0_10 = arith.constant 0 : index
    %17 = vector.load %arg9[%c0_9, %c0_10] : memref<128x1xf32, #tpu.memory_space<vmem>>, vector<128x1xf32>
    %cst_11 = arith.constant dense<0xFF800000> : vector<128xf32>
    %18 = vector.multi_reduction <maximumf>, %16, %cst_11 [1] : vector<128x128xf32> to vector<128xf32>
    %19 = vector.shape_cast %18 : vector<128xf32> to vector<128x1xf32>
    %20 = arith.maximumf %17, %19 : vector<128x1xf32>
    %21 = arith.subf %17, %20 : vector<128x1xf32>
    %22 = math.exp %21 : vector<128x1xf32>
    %23 = vector.broadcast %20 : vector<128x1xf32> to vector<128x128xf32>
    %24 = arith.subf %16, %23 : vector<128x128xf32>
    %25 = math.exp %24 : vector<128x128xf32>
    %c0_12 = arith.constant 0 : index
    %c0_13 = arith.constant 0 : index
    %26 = vector.load %arg10[%c0_12, %c0_13] : memref<128x1xf32, #tpu.memory_space<vmem>>, vector<128x1xf32>
    %27 = arith.mulf %22, %26 : vector<128x1xf32>
    %cst_14 = arith.constant dense<0.000000e+00> : vector<128xf32>
    %28 = vector.multi_reduction <add>, %25, %cst_14 [1] : vector<128x128xf32> to vector<128xf32>
    %29 = vector.shape_cast %28 : vector<128xf32> to vector<128x1xf32>
    %30 = arith.addf %27, %29 : vector<128x1xf32>
    %c0_15 = arith.constant 0 : index
    %c0_16 = arith.constant 0 : index
    %31 = vector.load %arg10[%c0_15, %c0_16] : memref<128x1xf32, #tpu.memory_space<vmem>>, vector<128x1xf32>
    tpu.vector_store %arg10[%c0_15, %c0_16], %30 {strides = array<i32>} : memref<128x1xf32, #tpu.memory_space<vmem>>, vector<128x1xf32>,
    %c0_17 = arith.constant 0 : index
    %c0_18 = arith.constant 0 : index
    %32 = vector.load %arg11[%c0_17, %c0_18] : memref<128x128xf32, #tpu.memory_space<vmem>>, vector<128x128xf32>
    %33 = vector.broadcast %22 : vector<128x1xf32> to vector<128x128xf32>
    %34 = arith.mulf %33, %32 : vector<128x128xf32>
    %35 = arith.truncf %25 : vector<128x128xf32> to vector<128x128xbf16>
    %cst_19 = arith.constant dense<0.000000e+00> : vector<128x128xf32>
    %36 = tpu.matmul %35, %14, %cst_19 {dimension_numbers = #tpu.dot_dimension_numbers<[1], [0], [0], [1], [0, 0, 1, 1], [], []>} : vector<128x128xbf16>, vector<128x128xbf16>, vector<128x128xf32> -> vector<128x128xf32>
    %37 = arith.addf %34, %36 : vector<128x128xf32>
    %c0_20 = arith.constant 0 : index
    %c0_21 = arith.constant 0 : index
    %38 = vector.load %arg11[%c0_20, %c0_21] : memref<128x128xf32, #tpu.memory_space<vmem>>, vector<128x128xf32>
    tpu.vector_store %arg11[%c0_20, %c0_21], %37 {strides = array<i32>} : memref<128x128xf32, #tpu.memory_space<vmem>>, vector<128x128xf32>,
    %c0_22 = arith.constant 0 : index
    %c0_23 = arith.constant 0 : index
    %39 = vector.load %arg9[%c0_22, %c0_23] : memref<128x1xf32, #tpu.memory_space<vmem>>, vector<128x1xf32>
    tpu.vector_store %arg9[%c0_22, %c0_23], %20 {strides = array<i32>} : memref<128x1xf32, #tpu.memory_space<vmem>>, vector<128x1xf32>,
    %c1_i32 = arith.constant 1 : i32
    %40 = arith.cmpi eq, %arg2, %c1_i32 : i32
    %41 = arith.extui %40 : i1 to i32
    %c0_i32_24 = arith.constant 0 : i32
    %42 = arith.cmpi ne, %41, %c0_i32_24 : i32
    scf.if %42 {
      %c0_25 = arith.constant 0 : index
      %c0_26 = arith.constant 0 : index
      %43 = vector.load %arg10[%c0_25, %c0_26] : memref<128x1xf32, #tpu.memory_space<vmem>>, vector<128x1xf32>
      %44 = tpu.reciprocal %43 {approx = true} : vector<128x1xf32> -> vector<128x1xf32>
      %c0_27 = arith.constant 0 : index
      %c0_28 = arith.constant 0 : index
      %45 = vector.load %arg11[%c0_27, %c0_28] : memref<128x128xf32, #tpu.memory_space<vmem>>, vector<128x128xf32>
      %46 = vector.broadcast %44 : vector<128x1xf32> to vector<128x128xf32>
      %47 = arith.mulf %45, %46 : vector<128x128xf32>
      %48 = arith.truncf %47 : vector<128x128xf32> to vector<128x128xbf16>
      %c0_29 = arith.constant 0 : index
      %c0_30 = arith.constant 0 : index
      %c0_31 = arith.constant 0 : index
      %49 = vector.load %arg7[%c0_29, %c0_30, %c0_31] : memref<1x128x128xbf16, #tpu.memory_space<vmem>>, vector<1x128x128xbf16>
      %50 = vector.shape_cast %49 : vector<1x128x128xbf16> to vector<128x128xbf16>
      %51 = vector.shape_cast %48 : vector<128x128xbf16> to vector<1x128x128xbf16>
      tpu.vector_store %arg7[%c0_29, %c0_30, %c0_31], %51 {strides = array<i32>} : memref<1x128x128xbf16, #tpu.memory_space<vmem>>, vector<1x128x128xbf16>,
    } else {
    }
    return
  }
  func.func @transform_0(%arg0: i32, %arg1: i32, %arg2: i32) -> (i32, i32, i32) {
    %c0_i32 = arith.constant 0 : i32
    %c0_i32_0 = arith.constant 0 : i32
    return %arg0, %arg1, %c0_i32 : i32, i32, i32
  }
  func.func @transform_1(%arg0: i32, %arg1: i32, %arg2: i32) -> (i32, i32, i32) {
    %c0_i32 = arith.constant 0 : i32
    %c0_i32_0 = arith.constant 0 : i32
    return %arg0, %arg2, %c0_i32 : i32, i32, i32
  }
  func.func @transform_2(%arg0: i32, %arg1: i32, %arg2: i32) -> (i32, i32) {
    %c0_i32 = arith.constant 0 : i32
    %c0_i32_0 = arith.constant 0 : i32
    %c0_i32_1 = arith.constant 0 : i32
    return %c0_i32, %c0_i32_0 : i32, i32
  }
  func.func @transform_3(%arg0: i32, %arg1: i32, %arg2: i32) -> (i32, i32) {
    %c0_i32 = arith.constant 0 : i32
    %c0_i32_0 = arith.constant 0 : i32
    %c0_i32_1 = arith.constant 0 : i32
    return %c0_i32, %c0_i32_0 : i32, i32
  }
  func.func @transform_4(%arg0: i32, %arg1: i32, %arg2: i32) -> (i32, i32, i32) {
    %c0_i32 = arith.constant 0 : i32
    %c0_i32_0 = arith.constant 0 : i32
    return %arg0, %arg1, %c0_i32 : i32, i32, i32
  }
}

</mosaic_0001>

<bundles_post_ra>
// kernel: tpu_custom_call.1
= control target key start
LH: loop header
LB: loop body
LE: loop exit
PB: predicated region body
PF: predicated region fallthrough
CT: control target
= control target key end

     0   :  { %9 = vsyncpa [#allocation7], 0  ;;  %s3036_s0 = inlined_call_operand.vmem [shape: f32[2,256,32], index: 0, kind: input, shape index: {}]   ;;  %s3037_s1 = inlined_call_operand.vmem [shape: f32[2,256,32], index: 1, kind: input, shape index: {}]   ;;  %s3038_s2 = inlined_call_operand.vmem [shape: bf16[32,384], index: 2, kind: input, shape index: {}]   ;;  %s3039_s3 = inlined_call_operand.vmem [shape: f32[1,384], index: 3, kind: input, shape index: {}]   ;;  %s3040_s4 = inlined_call_operand.hbm [shape: bf16[2,256,128], index: 4, kind: output, shape index: {}]  }
   0x1   :  { %11 = vsyncpa [#allocation7 + $0x1], 0  ;;  %s2393_s15 = smov 0   ;;  %s2395_s16 = smov 0  }
   0x2   :  { %s2397_s17 = smov 0   ;;  %s2399_s18 = smov 0  }
   0x3   :  { %s2401_s19 = smov 0   ;;  %s2403_s20 = smov 0  }
   0x4   :  { %s2405_s21 = smov 0   ;;  %s2407_s22 = smov 0  }
   0x5   :  { %s2409_s23 = smov 0   ;;  %s2411_s24 = smov 0  }
   0x6 LB: > { %3047 = sst [smem:[#allocation9_spill]] %s2347_s21  ;;  %s1796_s25 = sadd.s32 4294967295, %s2359_s24   ;;  %s2359_s24 = sphi %s2411_s24, %s17_s24   ;;  %s2355_s23 = sphi %s2409_s23, %s3061_s23   ;;  %s2351_s22 = sphi %s2407_s22, %s3060_s22   ;;  %s2347_s21 = sphi %s2405_s21, %s3059_s21   ;;  %s2343_s20 = sphi %s2403_s20, %s3058_s20   ;;  %s2339_s19 = sphi %s2401_s19, %s3057_s19   ;;  %s2335_s18 = sphi %s2399_s18, %s3056_s18   ;;  %s2331_s17 = sphi %s2397_s17, %s3064_s17   ;;  %s2327_s16 = sphi %s2395_s16, %s3063_s16   ;;  %s2323_s15 = sphi %s2393_s15, %s3062_s15  }
   0x7   : > { %3048 = sst [smem:[#allocation10_spill]] %s2351_s22  ;;  %s1797_s26 = sadd.s32 4294967294, %s2359_s24  }
   0x8   : > { %3049 = sst [smem:[#allocation11_spill]] %s2355_s23  ;;  %s29_s27 = sadd.s32 1, %s2347_s21 }
   0x9   : > { %p30_p0 = scmp.ge.s32.totalorder %s29_s27, 2  ;;  %s32_s28 = sadd.s32 1, %s2351_s22 }
   0xa   : > { %s36_s29 = sadd.s32 1, %s2355_s23  ;;  %p153_p1 = scmp.ne.s32.totalorder %s2331_s17, %s2327_s16 }
   0xb   : > { %s3066_s27 = smov (%p30_p0, %s29_s27), 0  ;;  %s3068_s28 = smov (!%p30_p0, %s32_s28), %s2351_s22 }
   0xc   : > { %3050 = sst [smem:[#allocation12_spill]] %s3066_s27  ;;  %p154_p2 = scmp.eq.s32.totalorder %s1796_s25, 7 }
   0xd   : > { %p159_p3 = scmp.ne.s32.totalorder %s2327_s16, %s2323_s15  ;;  %p34_p4 = scmp.ge.s32.totalorder %s3068_s28, 2 }
   0xe   : > { %p160_p5 = scmp.eq.s32.totalorder %s1797_s26, 7  ;;  %p2455_p6 = por %p154_p2, %p153_p1 }
   0xf   : > { %s3070_s28 = smov (%p34_p4, %s3068_s28), 0  ;;  %s3072_s29 = smov (!%p34_p4, %s36_s29), %s2355_s23 }
  0x10   : > { %3052 = sst [smem:[#allocation13_spill]] %s3070_s28  ;;  %p2462_p7 = por %p160_p5, %p159_p3 }
  0x11   : > { %p1800_p8 = scmp.ge.s32.totalorder %s2359_s24, 1  ;;  %p38_p9 = scmp.ge.s32.totalorder %s3072_s29, 2 }
  0x12   : > { %p210_p10 = scmp.lt.s32.totalorder %s2359_s24, 9  ;;  %s139_s6 = ssub.s32 %s2351_s22, %s3070_s28 }
  0x13   : > { %s3074_s29 = smov (%p38_p9, %s3072_s29), 0  ;;  %s143_s9 = sadd.s32 1, %s2331_s17 }
  0x14   : > { %3054 = sst [smem:[#allocation14_spill]] %s3074_s29  ;;  %p211_p11 = pnand %p1800_p8, %p210_p10 }
  0x15   : > { %s138_s7 = ssub.s32 %s2355_s23, %s3074_s29  ;;  %s3045_s11 = sand.u32 (!%p211_p11), 1, %s2327_s16  }
  0x16   : > { %s140_s8 = sor.u32 %s139_s6, %s138_s7  ;;  %214 = sbr.rel (%p211_p11) target bundleno = 1485 (0x5cd), region = 36 }
  0x17   : > { %p141_p12 = scmp.eq.s32.totalorder %s140_s8, 0  ;;  %s2480_s12 = sshll.u32 (!%p211_p11), %s2339_s19, 4 }
  0x18   : > { %s1801_s13 = sshll.u32 (!%p211_p11), %s3045_s11, 6  ;;  %p250_p13 = scmp.lt.s32.totalorder (!%p211_p11), %s2343_s20, 1 }
  0x19   : > { %s2476_s10 = scalar_select %p141_p12, %s2331_s17, %s143_s9  }
  0x1a   : > { %p252_p0 = scmp.lt.s32.totalorder (!%p211_p11), %s2480_s12, 31  ;;  %s1805_s6 = sshll.u32 (!%p211_p11), %s2335_s18, 4 }
  0x1b   : > { %p262_p1 = scmp.lt.s32.totalorder (!%p211_p11), %s1805_s6, 31  ;;  %s2499_s21 = scalar_lea.vmem (!%p211_p11), [#allocation6], %s1801_s13 }
  0x1c   : > { %p1808_p2 = scmp.ne.s32.totalorder (!%p211_p11), %s2335_s18, 0 }
  0x1d   : > { %s251_s14 = scalar_select %p250_p13, %s2343_s20, 1 }
  0x1e   : > { %s253_s25 = scalar_select %p252_p0, %s2480_s12, 31 }
  0x1f   : > { %s1803_s26 = sshll.u32 %s251_s14, 5  ;;  %s3076_s6 = smov (!%p262_p1, %s1805_s6), 31  ;;  %v2141_v0 = vld [vmem:[%s3038_s2] ss:$12 sps:$4 sm:$0xff] (!%p1808_p2)   ;;  %v2142_v1 = vld [vmem:[%s3038_s2 + $0x18] ss:$12 sps:$4 sm:$0xff] (!%p1808_p2)  }
  0x20   : > { %s255_s7 = sadd.s32 %s1803_s26, %s253_s25  ;;  %s265_s19 = sadd.s32 %s1803_s26, %s3076_s6  ;;  %1960 = vmatprep.subr.bf16.mxu0 (!%p1808_p2), %v2141_v0  ;;  %2044 = vmatprep.subr.bf16.mxu1 (!%p1808_p2), %v2141_v0  ;;  %vm322_vm0 = vcmask (!%p1808_p2), 261120   ;;  %vm476_vm1 = vcmask (!%p1808_p2), 7168   ;;  %v2361_v26 = vmov (!%p1808_p2), -inf   ;;  %v2362_v27 = vmov (!%p1808_p2), 0.0   ;;  %v1809_v28 = vld [vmem:[%s3039_s3] ss:$0 sm:$0xff] (!%p1808_p2) }
  0x21   : > { %s1804_s8 = sshll.u32 %s255_s7, 3  ;;  %s1807_s27 = sshll.u32 %s265_s19, 3  ;;  %1961 = vmatpush3.bf16.msra.mxu0 (!%p1808_p2), %v2141_v0  ;;  %2046 = vmatpush3.bf16.msra.mxu1 (!%p1808_p2), %v2141_v0  ;;  %477 = vst.msk [vmem:[#allocation3] sm:$0xff] (!%p1808_p2), %vm476_vm1, %v2361_v26  ;;  %478 = vst.msk [vmem:[#allocation3 + $0x8] sm:$0xff] (!%p1808_p2), %vm476_vm1, %v2361_v26 }
  0x22   : > { %s2492_s28 = scalar_lea.vmem %s3036_s0, %s1804_s8  ;;  %s2497_s11 = scalar_lea.vmem %s3037_s1, %s1807_s27  ;;  %1962 = vmatprep.subr.bf16.mxu0 (!%p1808_p2), %v2142_v1  ;;  %2045 = vmatprep.subr.bf16.mxu1 (!%p1808_p2), %v2142_v1  ;;  %479 = vst.msk [vmem:[#allocation3 + $0x10] sm:$0xff] (!%p1808_p2), %vm476_vm1, %v2361_v26  ;;  %480 = vst.msk [vmem:[#allocation3 + $0x18] sm:$0xff] (!%p1808_p2), %vm476_vm1, %v2361_v26 }
  0x23   : > { %274 = sbr.rel (%p1808_p2) target bundleno = 270 (0x10e), region = 40  ;;  %v275_v2 = vld [vmem:[%s2492_s28] sm:$0xff] (!%p1808_p2)  ;;  %v276_v3 = vld [vmem:[%s2492_s28 + $0x8] sm:$0xff] (!%p1808_p2)  ;;  %v277_v7 = vld [vmem:[%s2492_s28 + $0x10] sm:$0xff] (!%p1808_p2)  ;;  %481 = vst.msk [vmem:[#allocation3 + $0x20] sm:$0xff] (!%p1808_p2), %vm476_vm1, %v2361_v26 }
  0x24   : > { %v283_v4 = vld [vmem:[%s2492_s28 + $0x40] sm:$0xff] (!%p1808_p2)  ;;  %v291_v5 = vpack.c.bf16 (!%p1808_p2), %v276_v3, %v275_v2  ;;  %v284_v6 = vld [vmem:[%s2492_s28 + $0x48] sm:$0xff] (!%p1808_p2)  ;;  %v278_v8 = vld [vmem:[%s2492_s28 + $0x18] sm:$0xff] (!%p1808_p2)  ;;  %482 = vst.msk [vmem:[#allocation3 + $0x28] sm:$0xff] (!%p1808_p2), %vm476_vm1, %v2361_v26 }
  0x25   : > { %v295_v9 = vpack.c.bf16 (!%p1808_p2), %v284_v6, %v283_v4  ;;  %v285_v10 = vld [vmem:[%s2492_s28 + $0x50] sm:$0xff] (!%p1808_p2)  ;;  %v286_v11 = vld [vmem:[%s2492_s28 + $0x58] sm:$0xff] (!%p1808_p2)  ;;  %v279_v12 = vld [vmem:[%s2492_s28 + $0x20] sm:$0xff] (!%p1808_p2)  ;;  %v292_v16 = vpack.c.bf16 (!%p1808_p2), %v278_v8, %v277_v7  ;;  %1963 = vmatpush3.bf16.msra.mxu0 (!%p1808_p2), %v2142_v1  ;;  %2047 = vmatpush3.bf16.msra.mxu1 (!%p1808_p2), %v2142_v1  ;;  %483 = vst.msk [vmem:[#allocation3 + $0x30] sm:$0xff] (!%p1808_p2), %vm476_vm1, %v2361_v26 }
  0x26   : > { %1964 = vmatprep.mubr.msk.bf16.mxu0 (!%p1808_p2), %vm322_vm0, %v291_v5  ;;  %v280_v13 = vld [vmem:[%s2492_s28 + $0x28] sm:$0xff] (!%p1808_p2)  ;;  %v287_v14 = vld [vmem:[%s2492_s28 + $0x60] sm:$0xff] (!%p1808_p2)  ;;  %v296_v17 = vpack.c.bf16 (!%p1808_p2), %v286_v11, %v285_v10  ;;  %v281_v20 = vld [vmem:[%s2492_s28 + $0x30] sm:$0xff] (!%p1808_p2)  ;;  %484 = vst.msk [vmem:[#allocation3 + $0x38] sm:$0xff] (!%p1808_p2), %vm476_vm1, %v2361_v26 }
  0x27   : > { %v288_v15 = vld [vmem:[%s2492_s28 + $0x68] sm:$0xff] (!%p1808_p2)  ;;  %1972 = vmatprep.mubr.msk.bf16.mxu1 (!%p1808_p2), %vm322_vm0, %v295_v9  ;;  %v293_v18 = vpack.c.bf16 (!%p1808_p2), %v280_v13, %v279_v12  ;;  %v282_v21 = vld [vmem:[%s2492_s28 + $0x38] sm:$0xff] (!%p1808_p2)  ;;  %v289_v22 = vld [vmem:[%s2492_s28 + $0x70] sm:$0xff] (!%p1808_p2)  ;;  %485 = vst.msk [vmem:[#allocation3 + $0x40] sm:$0xff] (!%p1808_p2), %vm476_vm1, %v2361_v26 }
  0x28   : > { %v297_v19 = vpack.c.bf16 (!%p1808_p2), %v288_v15, %v287_v14  ;;  %1965 = vmatmul.mubr.msk.bf16.vlgmr.msra.gmra.mrb[0].mxu0 (!%p1808_p2), %vm322_vm0, %v292_v16  ;;  %1973 = vmatmul.mubr.msk.bf16.vlgmr.msra.gmra.mrb[0].mxu1 (!%p1808_p2), %vm322_vm0, %v296_v17  ;;  %v290_v23 = vld [vmem:[%s2492_s28 + $0x78] sm:$0xff] (!%p1808_p2)  ;;  %v294_v24 = vpack.c.bf16 (!%p1808_p2), %v282_v21, %v281_v20  ;;  %486 = vst.msk [vmem:[#allocation3 + $0x48] sm:$0xff] (!%p1808_p2), %vm476_vm1, %v2361_v26  ;;  %487 = vst.msk [vmem:[#allocation3 + $0x50] sm:$0xff] (!%p1808_p2), %vm476_vm1, %v2361_v26 }
  0x29   : > { %1968 = vmatprep.mubr.msk.bf16.mxu0 (!%p1808_p2), %vm322_vm0, %v293_v18  ;;  %v298_v25 = vpack.c.bf16 (!%p1808_p2), %v290_v23, %v289_v22  ;;  %488 = vst.msk [vmem:[#allocation3 + $0x58] sm:$0xff] (!%p1808_p2), %vm476_vm1, %v2361_v26  ;;  %489 = vst.msk [vmem:[#allocation3 + $0x60] sm:$0xff] (!%p1808_p2), %vm476_vm1, %v2361_v26 }
  0x2a   : > { %1976 = vmatprep.mubr.msk.bf16.mxu1 %vm322_vm0, %v297_v19  ;;  %490 = vst.msk [vmem:[#allocation3 + $0x68] sm:$0xff] %vm476_vm1, %v2361_v26  ;;  %491 = vst.msk [vmem:[#allocation3 + $0x70] sm:$0xff] %vm476_vm1, %v2361_v26 }
  0x2b   : > { %492 = vst.msk [vmem:[#allocation3 + $0x78] sm:$0xff] %vm476_vm1, %v2361_v26  ;;  %493 = vst.msk [vmem:[#allocation4] sm:$0xff] %vm476_vm1, %v2362_v27 }
  0x2c   : > { %494 = vst.msk [vmem:[#allocation4 + $0x8] sm:$0xff] %vm476_vm1, %v2362_v27  ;;  %495 = vst.msk [vmem:[#allocation4 + $0x10] sm:$0xff] %vm476_vm1, %v2362_v27 }
  0x2d   : > { %496 = vst.msk [vmem:[#allocation4 + $0x18] sm:$0xff] %vm476_vm1, %v2362_v27  ;;  %497 = vst.msk [vmem:[#allocation4 + $0x20] sm:$0xff] %vm476_vm1, %v2362_v27 }
  0x2e   : > { %498 = vst.msk [vmem:[#allocation4 + $0x28] sm:$0xff] %vm476_vm1, %v2362_v27  ;;  %499 = vst.msk [vmem:[#allocation4 + $0x30] sm:$0xff] %vm476_vm1, %v2362_v27 }
  0x2f   : > { %500 = vst.msk [vmem:[#allocation4 + $0x38] sm:$0xff] %vm476_vm1, %v2362_v27  ;;  %501 = vst.msk [vmem:[#allocation4 + $0x40] sm:$0xff] %vm476_vm1, %v2362_v27 }
  0x30   : > { %1969 = vmatmul.mubr.msk.bf16.gmra.mrb[4].mxu0 %vm322_vm0, %v294_v24  ;;  %1977 = vmatmul.mubr.msk.bf16.gmra.mrb[4].mxu1 %vm322_vm0, %v298_v25  ;;  %502 = vst.msk [vmem:[#allocation4 + $0x48] sm:$0xff] %vm476_vm1, %v2362_v27  ;;  %503 = vst.msk [vmem:[#allocation4 + $0x50] sm:$0xff] %vm476_vm1, %v2362_v27 }
  0x31   : > { %504 = vst.msk [vmem:[#allocation4 + $0x58] sm:$0xff] %vm476_vm1, %v2362_v27  ;;  %505 = vst.msk [vmem:[#allocation4 + $0x60] sm:$0xff] %vm476_vm1, %v2362_v27 }
  0x32   : > { %506 = vst.msk [vmem:[#allocation4 + $0x68] sm:$0xff] %vm476_vm1, %v2362_v27  ;;  %507 = vst.msk [vmem:[#allocation4 + $0x70] sm:$0xff] %vm476_vm1, %v2362_v27 }
  0x33   : > { %508 = vst.msk [vmem:[#allocation4 + $0x78] sm:$0xff] %vm476_vm1, %v2362_v27  ;;  %509 = vst [vmem:[#allocation5] sm:$0xff] %v2362_v27 }
  0x34   : > { %510 = vst [vmem:[#allocation5 + $0x8] sm:$0xff] %v2362_v27  ;;  %511 = vst [vmem:[#allocation5 + $0x10] sm:$0xff] %v2362_v27 }
  0x35   : > { %512 = vst [vmem:[#allocation5 + $0x18] sm:$0xff] %v2362_v27  ;;  %513 = vst [vmem:[#allocation5 + $0x20] sm:$0xff] %v2362_v27 }
  0x36   : > { %514 = vst [vmem:[#allocation5 + $0x28] sm:$0xff] %v2362_v27  ;;  %515 = vst [vmem:[#allocation5 + $0x30] sm:$0xff] %v2362_v27 }
  0x37   : > { %516 = vst [vmem:[#allocation5 + $0x38] sm:$0xff] %v2362_v27  ;;  %517 = vst [vmem:[#allocation5 + $0x40] sm:$0xff] %v2362_v27 }
  0x38   : > { %518 = vst [vmem:[#allocation5 + $0x48] sm:$0xff] %v2362_v27  ;;  %519 = vst [vmem:[#allocation5 + $0x50] sm:$0xff] %v2362_v27 }
  0x39   : > { %520 = vst [vmem:[#allocation5 + $0x58] sm:$0xff] %v2362_v27  ;;  %521 = vst [vmem:[#allocation5 + $0x60] sm:$0xff] %v2362_v27 }
  0x3a   : > { %522 = vst [vmem:[#allocation5 + $0x68] sm:$0xff] %v2362_v27  ;;  %523 = vst [vmem:[#allocation5 + $0x70] sm:$0xff] %v2362_v27 }
  0x3b   : > { %524 = vst [vmem:[#allocation5 + $0x78] sm:$0xff] %v2362_v27 }
  0xfb   : > { %v1966_v29 = vpop.f32.mrb[0].mxu0  ;;  %v1974_v30 = vpop.f32.mrb[0].mxu1 }
  0xfc   : > { %v390_v31 = vadd.f32 %v1966_v29, %v1809_v28  ;;  %v422_v32 = vadd.f32 %v1974_v30, %v1809_v28  ;;  %v381_v33 = vpop.f32.mrb[1].mxu0  ;;  %v413_v34 = vpop.f32.mrb[1].mxu1 }
  0xfd   : > { %v382_v35 = vadd.f32 %v1809_v28, %v381_v33  ;;  %v414_v36 = vadd.f32 %v1809_v28, %v413_v34  ;;  %v1967_v37 = vpop.f32.mrb[2].mxu0  ;;  %v1975_v38 = vpop.f32.mrb[2].mxu1 }
  0xfe   : > { %v393_v39 = vadd.f32 %v1967_v37, %v1809_v28  ;;  %v425_v40 = vadd.f32 %v1975_v38, %v1809_v28  ;;  %v384_v41 = vpop.f32.mrb[3].mxu0  ;;  %v416_v42 = vpop.f32.mrb[3].mxu1  ;;  %v446_v43 = vmul.f32 0.17677669, %v390_v31  ;;  %v454_v44 = vmul.f32 0.17677669, %v422_v32 }
  0xff   : > { %v385_v45 = vadd.f32 %v1809_v28, %v384_v41  ;;  %v417_v46 = vadd.f32 %v1809_v28, %v416_v42  ;;  %v444_v47 = vmul.f32 0.17677669, %v382_v35  ;;  %v452_v50 = vmul.f32 0.17677669, %v414_v36 }
 0x100   : > { %v447_v48 = vmul.f32 0.17677669, %v393_v39  ;;  %v455_v49 = vmul.f32 0.17677669, %v425_v40 }
 0x101   : > { %v445_v51 = vmul.f32 0.17677669, %v385_v45  ;;  %v453_v52 = vmul.f32 0.17677669, %v417_v46 }
 0x102   : > { %v461_v53 = vpack.c.bf16 %v447_v48, %v446_v43  ;;  %v465_v54 = vpack.c.bf16 %v455_v49, %v454_v44 }
 0x103   : > { %v460_v55 = vpack.c.bf16 %v445_v51, %v444_v47  ;;  %v464_v56 = vpack.c.bf16 %v453_v52, %v452_v50  ;;  %v1970_v57 = vpop.f32.mrb[4].mxu0  ;;  %v1978_v58 = vpop.f32.mrb[4].mxu1 }
 0x104   : > { %469 = vst [vmem:[#allocation2 + $0x8] sm:$0xff] %v461_v53  ;;  %473 = vst [vmem:[#allocation2 + $0x28] sm:$0xff] %v465_v54  ;;  %v406_v59 = vadd.f32 %v1970_v57, %v1809_v28  ;;  %v438_v60 = vadd.f32 %v1978_v58, %v1809_v28  ;;  %v397_v61 = vpop.f32.mrb[5].mxu0  ;;  %v429_v62 = vpop.f32.mrb[5].mxu1 }
 0x105   : > { %468 = vst [vmem:[#allocation2] sm:$0xff] %v460_v55  ;;  %472 = vst [vmem:[#allocation2 + $0x20] sm:$0xff] %v464_v56  ;;  %v398_v63 = vadd.f32 %v1809_v28, %v397_v61  ;;  %v430_v0 = vadd.f32 %v1809_v28, %v429_v62  ;;  %v1971_v1 = vpop.f32.mrb[6].mxu0  ;;  %v1979_v2 = vpop.f32.mrb[6].mxu1 }
 0x106   : > { %v409_v3 = vadd.f32 %v1971_v1, %v1809_v28  ;;  %v441_v4 = vadd.f32 %v1979_v2, %v1809_v28  ;;  %v400_v5 = vpop.f32.mrb[7].mxu0  ;;  %v432_v6 = vpop.f32.mrb[7].mxu1  ;;  %v450_v7 = vmul.f32 0.17677669, %v406_v59  ;;  %v458_v8 = vmul.f32 0.17677669, %v438_v60 }
 0x107   : > { %v401_v9 = vadd.f32 %v1809_v28, %v400_v5  ;;  %v433_v10 = vadd.f32 %v1809_v28, %v432_v6  ;;  %v448_v11 = vmul.f32 0.17677669, %v398_v63  ;;  %v456_v14 = vmul.f32 0.17677669, %v430_v0 }
 0x108   : > { %v451_v12 = vmul.f32 0.17677669, %v409_v3  ;;  %v459_v13 = vmul.f32 0.17677669, %v441_v4 }
 0x109   : > { %v449_v15 = vmul.f32 0.17677669, %v401_v9  ;;  %v457_v16 = vmul.f32 0.17677669, %v433_v10 }
 0x10a   : > { %v463_v17 = vpack.c.bf16 %v451_v12, %v450_v7  ;;  %v467_v18 = vpack.c.bf16 %v459_v13, %v458_v8 }
 0x10b   : > { %v462_v19 = vpack.c.bf16 %v449_v15, %v448_v11  ;;  %v466_v20 = vpack.c.bf16 %v457_v16, %v456_v14 }
 0x10c   : > { %471 = vst [vmem:[#allocation2 + $0x18] sm:$0xff] %v463_v17  ;;  %475 = vst [vmem:[#allocation2 + $0x38] sm:$0xff] %v467_v18 }
 0x10d   : > { %470 = vst [vmem:[#allocation2 + $0x10] sm:$0xff] %v462_v19  ;;  %474 = vst [vmem:[#allocation2 + $0x30] sm:$0xff] %v466_v20 }
 0x10e PF: > { %v2145_v21 = vld [vmem:[%s3038_s2 + $0x8] ss:$12 sps:$4 sm:$0xff]   ;;  %v2147_v22 = vld [vmem:[%s3038_s2 + $0x4] ss:$12 sps:$4 sm:$0xff]   ;;  %v2363_v23 = vmov 0   ;;  %vm585_vm2 = vcmask 261120   ;;  %v555_v51 = vlaneseq }
 0x10f   : > { %642 = vmatprep.mubr.bf16.mxu0 %v2363_v23  ;;  %2144 = vset.pattern.permute.xlu1 %v2363_v23  ;;  %v2148_v24 = vld [vmem:[%s3038_s2 + $0x20] ss:$12 sps:$4 sm:$0xff]   ;;  %v2150_v25 = vld [vmem:[%s3038_s2 + $0x1c] ss:$12 sps:$4 sm:$0xff]   ;;  %v527_v29 = vld [vmem:[%s2497_s11 + $0x10] sm:$0xff]  ;;  %vm1164_vm3 = vcmask 7168  }
 0x110   : > { %610 = vmatprep.subr.bf16.mxu0 %v2145_v21  ;;  %2143 = vset.pattern.permute.xlu0 %v2363_v23  ;;  %v525_v26 = vld [vmem:[%s2497_s11] sm:$0xff]  ;;  %v526_v27 = vld [vmem:[%s2497_s11 + $0x8] sm:$0xff]  ;;  %v528_v30 = vld [vmem:[%s2497_s11 + $0x18] sm:$0xff]  ;;  %v556_v52 = vshrl.u32 %v555_v51, 7  ;;  %p1832_p3 = scmp.ne.s32.totalorder %s2335_s18, 1 }
 0x111   : > { %611 = vmatpush1.bf16.msra.mxu0 %v2147_v22  ;;  %v541_v28 = vpack.c.bf16 %v526_v27, %v525_v26  ;;  %v542_v31 = vpack.c.bf16 %v528_v30, %v527_v29  ;;  %v529_v32 = vld [vmem:[%s2497_s11 + $0x20] sm:$0xff]  ;;  %v530_v33 = vld [vmem:[%s2497_s11 + $0x28] sm:$0xff]  ;;  %v531_v35 = vld [vmem:[%s2497_s11 + $0x30] sm:$0xff] }
 0x112   : > { %612 = vmatprep.subr.bf16.mxu0 %v2148_v24  ;;  %v543_v34 = vpack.c.bf16 %v530_v33, %v529_v32  ;;  %v532_v36 = vld [vmem:[%s2497_s11 + $0x38] sm:$0xff]  ;;  %v533_v38 = vld [vmem:[%s2497_s11 + $0x40] sm:$0xff]  ;;  %v534_v39 = vld [vmem:[%s2497_s11 + $0x48] sm:$0xff]  ;;  %v557_v53 = vsub.s32 0, %v556_v52  ;;  %v561_v55 = vsub.s32 1, %v556_v52 }
 0x113   : > { %v544_v37 = vpack.c.bf16 %v532_v36, %v531_v35  ;;  %v545_v40 = vpack.c.bf16 %v534_v39, %v533_v38  ;;  %v535_v41 = vld [vmem:[%s2497_s11 + $0x50] sm:$0xff]  ;;  %v536_v42 = vld [vmem:[%s2497_s11 + $0x58] sm:$0xff]  ;;  %v537_v44 = vld [vmem:[%s2497_s11 + $0x60] sm:$0xff] }
 0x114   : > { %v546_v43 = vpack.c.bf16 %v536_v42, %v535_v41  ;;  %v538_v45 = vld [vmem:[%s2497_s11 + $0x68] sm:$0xff]  ;;  %v539_v47 = vld [vmem:[%s2497_s11 + $0x70] sm:$0xff]  ;;  %v540_v48 = vld [vmem:[%s2497_s11 + $0x78] sm:$0xff] }
 0x115   : > { %613 = vmatpush1.bf16.msra.mxu0 %v2150_v25  ;;  %v547_v46 = vpack.c.bf16 %v538_v45, %v537_v44  ;;  %v548_v49 = vpack.c.bf16 %v540_v48, %v539_v47  ;;  %v739_v50 = vld [vmem:[#allocation2] sm:$0xff] }
 0x116   : > { %1996 = vmatprep.mubr.bf16.mxu1 %v739_v50  ;;  %v553_v54 = vld [vmem:[%s3039_s3 + $0x1] sm:$0x3] }
 0x117   : > { %v2606_v56 = vrot.slane %v553_v54, %v557_v53  ;;  %v2608_v58 = vrot.slane %v553_v54, %v561_v55 }
 0x118   : > { %1824 = vmatmul.mubr.msk.bf16.vlgmr.msra.gmra.mrb[0].mxu0 %vm585_vm2, %v541_v28 }
 0x119   : > { %652 = vmatprep.mubr.bf16.mxu0 %v2363_v23 }
 0x120   : > { %1825 = vmatmul.mubr.msk.bf16.gmra.mrb[4].mxu0 %vm585_vm2, %v542_v31 }
 0x121   : > { %662 = vmatprep.mubr.bf16.mxu0 %v2363_v23 }
 0x128   : > { %1826 = vmatmul.mubr.msk.bf16.gmra.mrb[8].mxu0 %vm585_vm2, %v543_v34 }
 0x129   : > { %672 = vmatprep.mubr.bf16.mxu0 %v2363_v23 }
 0x130   : > { %1827 = vmatmul.mubr.msk.bf16.gmra.mrb[12].mxu0 %vm585_vm2, %v544_v37 }
 0x131   : > { %682 = vmatprep.mubr.bf16.mxu0 %v2363_v23 }
 0x138   : > { %1828 = vmatmul.mubr.msk.bf16.gmra.mrb[16].mxu0 %vm585_vm2, %v545_v40 }
 0x139   : > { %692 = vmatprep.mubr.bf16.mxu0 %v2363_v23 }
 0x140   : > { %1829 = vmatmul.mubr.msk.bf16.gmra.mrb[20].mxu0 %vm585_vm2, %v546_v43 }
 0x141   : > { %702 = vmatprep.mubr.bf16.mxu0 %v2363_v23 }
 0x148   : > { %1830 = vmatmul.mubr.msk.bf16.gmra.mrb[24].mxu0 %vm585_vm2, %v547_v46 }
 0x149   : > { %712 = vmatprep.mubr.bf16.mxu0 %v2363_v23 }
 0x150   : > { %1831 = vmatmul.mubr.msk.bf16.gmra.mrb[28].mxu0 %vm585_vm2, %v548_v49 }
 0x1eb   : > { %v644_v57 = vpop.f32.mrb[0].mxu0 }
 0x1ec   : > { %v646_v59 = vpop.f32.mrb[1].mxu0  ;;  %v645_v61 = vadd.f32 %v644_v57, %v2606_v56 }
 0x1ed   : > { %v648_v60 = vpop.f32.mrb[2].mxu0  ;;  %v647_v0 = vadd.f32 %v646_v59, %v2608_v58 }
 0x1ee   : > { %v649_v62 = vadd.f32 %v648_v60, %v2606_v56  ;;  %v650_v63 = vpop.f32.mrb[3].mxu0 }
 0x1ef   : > { %v651_v1 = vadd.f32 %v650_v63, %v2608_v58 }
 0x1f0   : > { %v723_v2 = vpack.c.bf16 %v649_v62, %v645_v61 }
 0x1f1   : > { %v731_v3 = vpack.c.bf16 %v651_v1, %v647_v0 }
 0x1f2   : > { %1980 = vmatprep.subr.bf16.mxu1 %v723_v2 }
 0x1f3   : > { %v654_v4 = vpop.f32.mrb[4].mxu0  ;;  %1981 = vmatpush3.bf16.xpose.msra.mxu1 %v723_v2  ;;  %2012 = vmatprep.subr.bf16.mxu0 %v731_v3 }
 0x1f4   : > { %v656_v5 = vpop.f32.mrb[5].mxu0  ;;  %2013 = vmatpush3.bf16.msra.mxu0 %v731_v3  ;;  %v655_v7 = vadd.f32 %v654_v4, %v2606_v56 }
 0x1f5   : > { %v658_v6 = vpop.f32.mrb[6].mxu0  ;;  %v657_v10 = vadd.f32 %v656_v5, %v2608_v58 }
 0x1f6   : > { %v659_v8 = vadd.f32 %v658_v6, %v2606_v56  ;;  %v660_v9 = vpop.f32.mrb[7].mxu0 }
 0x1f7   : > { %v661_v11 = vadd.f32 %v660_v9, %v2608_v58 }
 0x1f8   : > { %v724_v12 = vpack.c.bf16 %v659_v8, %v655_v7 }
 0x1f9   : > { %v732_v13 = vpack.c.bf16 %v661_v11, %v657_v10 }
 0x1fa   : > { %1982 = vmatprep.subr.bf16.mxu1 %v724_v12 }
 0x1fb   : > { %v664_v14 = vpop.f32.mrb[8].mxu0  ;;  %1983 = vmatpush3.bf16.xpose.msra.mxu1 %v724_v12  ;;  %2014 = vmatprep.subr.bf16.mxu0 %v732_v13  ;;  %v740_v12 = vld [vmem:[#allocation2 + $0x8] sm:$0xff] }
 0x1fc   : > { %v666_v15 = vpop.f32.mrb[9].mxu0  ;;  %2015 = vmatpush3.bf16.msra.mxu0 %v732_v13  ;;  %v665_v17 = vadd.f32 %v664_v14, %v2606_v56  ;;  %v741_v13 = vld [vmem:[#allocation2 + $0x10] sm:$0xff]  ;;  %v742_v14 = vld [vmem:[#allocation2 + $0x18] sm:$0xff] }
 0x1fd   : > { %v668_v16 = vpop.f32.mrb[10].mxu0  ;;  %v667_v20 = vadd.f32 %v666_v15, %v2608_v58  ;;  %v743_v15 = vld [vmem:[#allocation2 + $0x20] sm:$0xff] }
 0x1fe   : > { %v669_v18 = vadd.f32 %v668_v16, %v2606_v56  ;;  %v670_v19 = vpop.f32.mrb[11].mxu0  ;;  %v745_v16 = vld [vmem:[#allocation2 + $0x30] sm:$0xff] }
 0x1ff   : > { %v671_v21 = vadd.f32 %v670_v19, %v2608_v58 }
 0x200   : > { %v725_v22 = vpack.c.bf16 %v669_v18, %v665_v17  ;;  %v746_v17 = vld [vmem:[#allocation2 + $0x38] sm:$0xff] }
 0x201   : > { %v733_v23 = vpack.c.bf16 %v671_v21, %v667_v20 }
 0x202   : > { %1984 = vmatprep.subr.bf16.mxu1 %v725_v22 }
 0x203   : > { %v674_v24 = vpop.f32.mrb[12].mxu0  ;;  %1985 = vmatpush3.bf16.xpose.msra.mxu1 %v725_v22  ;;  %2016 = vmatprep.subr.bf16.mxu0 %v733_v23 }
 0x204   : > { %v676_v25 = vpop.f32.mrb[13].mxu0  ;;  %2017 = vmatpush3.bf16.msra.mxu0 %v733_v23  ;;  %v675_v27 = vadd.f32 %v674_v24, %v2606_v56 }
 0x205   : > { %v678_v26 = vpop.f32.mrb[14].mxu0  ;;  %v677_v30 = vadd.f32 %v676_v25, %v2608_v58 }
 0x206   : > { %v679_v28 = vadd.f32 %v678_v26, %v2606_v56  ;;  %v680_v29 = vpop.f32.mrb[15].mxu0 }
 0x207   : > { %v681_v31 = vadd.f32 %v680_v29, %v2608_v58 }
 0x208   : > { %v726_v32 = vpack.c.bf16 %v679_v28, %v675_v27 }
 0x209   : > { %v734_v33 = vpack.c.bf16 %v681_v31, %v677_v30 }
 0x20a   : > { %1986 = vmatprep.subr.bf16.mxu1 %v726_v32 }
 0x20b   : > { %v684_v34 = vpop.f32.mrb[16].mxu0  ;;  %1987 = vmatpush3.bf16.xpose.msra.mxu1 %v726_v32  ;;  %2018 = vmatprep.subr.bf16.mxu0 %v734_v33 }
 0x20c   : > { %v686_v35 = vpop.f32.mrb[17].mxu0  ;;  %2019 = vmatpush3.bf16.msra.mxu0 %v734_v33  ;;  %v685_v37 = vadd.f32 %v684_v34, %v2606_v56  ;;  %v2690_v33 = vld [vmem:[#allocation3 + $0x10] sm:$0xff]  ;;  %v844_v34 = vld [vmem:[#allocation3] sm:$0xff] }
 0x20d   : > { %v688_v36 = vpop.f32.mrb[18].mxu0  ;;  %v687_v40 = vadd.f32 %v686_v35, %v2608_v58 }
 0x20e   : > { %v689_v38 = vadd.f32 %v688_v36, %v2606_v56  ;;  %v690_v39 = vpop.f32.mrb[19].mxu0 }
 0x20f   : > { %v691_v41 = vadd.f32 %v690_v39, %v2608_v58  ;;  %v2695_v39 = vld [vmem:[#allocation3 + $0x18] sm:$0xff] }
 0x210   : > { %v727_v42 = vpack.c.bf16 %v689_v38, %v685_v37 }
 0x211   : > { %v735_v43 = vpack.c.bf16 %v691_v41, %v687_v40  ;;  %v2700_v40 = vld [vmem:[#allocation3 + $0x8] sm:$0xff] }
 0x212   : > { %1988 = vmatprep.subr.bf16.mxu1 %v727_v42 }
 0x213   : > { %v694_v44 = vpop.f32.mrb[20].mxu0  ;;  %1989 = vmatpush3.bf16.xpose.msra.mxu1 %v727_v42  ;;  %2020 = vmatprep.subr.bf16.mxu0 %v735_v43 }
 0x214   : > { %v696_v45 = vpop.f32.mrb[21].mxu0  ;;  %2021 = vmatpush3.bf16.msra.mxu0 %v735_v43  ;;  %v695_v47 = vadd.f32 %v694_v44, %v2606_v56 }
 0x215   : > { %v698_v46 = vpop.f32.mrb[22].mxu0  ;;  %v697_v50 = vadd.f32 %v696_v45, %v2608_v58  ;;  %v2708_v45 = vld [vmem:[#allocation3 + $0x20] sm:$0xff] }
 0x216   : > { %v699_v48 = vadd.f32 %v698_v46, %v2606_v56  ;;  %v700_v49 = vpop.f32.mrb[23].mxu0  ;;  %v2712_v46 = vld [vmem:[#allocation3 + $0x38] sm:$0xff] }
 0x217   : > { %v701_v51 = vadd.f32 %v700_v49, %v2608_v58 }
 0x218   : > { %v728_v52 = vpack.c.bf16 %v699_v48, %v695_v47 }
 0x219   : > { %v736_v53 = vpack.c.bf16 %v701_v51, %v697_v50  ;;  %v2721_v51 = vld [vmem:[#allocation3 + $0x30] sm:$0xff] }
 0x21a   : > { %1990 = vmatprep.subr.bf16.mxu1 %v728_v52 }
 0x21b   : > { %v704_v54 = vpop.f32.mrb[24].mxu0  ;;  %1991 = vmatpush3.bf16.xpose.msra.mxu1 %v728_v52  ;;  %2022 = vmatprep.subr.bf16.mxu0 %v736_v53  ;;  %v849_v52 = vld [vmem:[#allocation3 + $0x28] sm:$0xff] }
 0x21c   : > { %v706_v55 = vpop.f32.mrb[25].mxu0  ;;  %2023 = vmatpush3.bf16.msra.mxu0 %v736_v53  ;;  %v705_v59 = vadd.f32 %v704_v54, %v2606_v56 }
 0x21d   : > { %v708_v57 = vpop.f32.mrb[26].mxu0  ;;  %v707_v62 = vadd.f32 %v706_v55, %v2608_v58 }
 0x21e   : > { %v709_v60 = vadd.f32 %v708_v57, %v2606_v56  ;;  %v710_v61 = vpop.f32.mrb[27].mxu0 }
 0x21f   : > { %v711_v63 = vadd.f32 %v710_v61, %v2608_v58 }
 0x220   : > { %v729_v0 = vpack.c.bf16 %v709_v60, %v705_v59  ;;  %v2730_v59 = vld [vmem:[#allocation3 + $0x40] sm:$0xff]  ;;  %v2735_v60 = vld [vmem:[#allocation3 + $0x58] sm:$0xff] }
 0x221   : > { %v737_v1 = vpack.c.bf16 %v711_v63, %v707_v62 }
 0x222   : > { %1992 = vmatprep.subr.bf16.mxu1 %v729_v0 }
 0x223   : > { %v714_v2 = vpop.f32.mrb[28].mxu0  ;;  %1993 = vmatpush3.bf16.xpose.msra.mxu1 %v729_v0  ;;  %2024 = vmatprep.subr.bf16.mxu0 %v737_v1 }
 0x224   : > { %v716_v3 = vpop.f32.mrb[29].mxu0  ;;  %2025 = vmatpush3.bf16.msra.mxu0 %v737_v1  ;;  %v715_v5 = vadd.f32 %v714_v2, %v2606_v56  ;;  %v2744_v1 = vld [vmem:[#allocation3 + $0x50] sm:$0xff]  ;;  %v2749_v2 = vld [vmem:[#allocation3 + $0x48] sm:$0xff] }
 0x225   : > { %v718_v4 = vpop.f32.mrb[30].mxu0  ;;  %v717_v8 = vadd.f32 %v716_v3, %v2608_v58 }
 0x226   : > { %v719_v6 = vadd.f32 %v718_v4, %v2606_v56  ;;  %v720_v7 = vpop.f32.mrb[31].mxu0  ;;  %v744_v56 = vld [vmem:[#allocation2 + $0x28] sm:$0xff] }
 0x227   : > { %v721_v9 = vadd.f32 %v720_v7, %v2608_v58 }
 0x228   : > { %v730_v10 = vpack.c.bf16 %v719_v6, %v715_v5 }
 0x229   : > { %v738_v11 = vpack.c.bf16 %v721_v9, %v717_v8  ;;  %v2757_v8 = vld [vmem:[#allocation3 + $0x60] sm:$0xff]  ;;  %v2761_v9 = vld [vmem:[#allocation3 + $0x78] sm:$0xff] }
 0x22a   : > { %1994 = vmatprep.subr.bf16.mxu1 %v730_v10 }
 0x22b   : > { %1995 = vmatpush3.bf16.xpose.msra.mxu1 %v730_v10  ;;  %2026 = vmatprep.subr.bf16.mxu0 %v738_v11 }
 0x22c   : > { %2027 = vmatpush3.bf16.msra.mxu0 %v738_v11 }
 0x232   : > { %1997 = vmatmul.mubr.bf16.vlgmr.msra.gmra.mrb[0].mxu1 %v740_v12 }
 0x233   : > { %2000 = vmatprep.mubr.bf16.mxu1 %v741_v13 }
 0x23a   : > { %2001 = vmatmul.mubr.bf16.gmra.mrb[4].mxu1 %v742_v14 }
 0x23b   : > { %2004 = vmatprep.mubr.bf16.mxu1 %v743_v15 }
 0x242   : > { %2005 = vmatmul.mubr.bf16.gmra.mrb[8].mxu1 %v744_v56  ;;  %v2771_v56 = vld [vmem:[#allocation3 + $0x70] sm:$0xff] }
 0x243   : > { %2008 = vmatprep.mubr.bf16.mxu1 %v745_v16  ;;  %v857_v16 = vld [vmem:[#allocation3 + $0x68] sm:$0xff] }
 0x24a   : > { %2009 = vmatmul.mubr.bf16.gmra.mrb[12].mxu1 %v746_v17 }
 0x305   : > { %v2642_v58 = vpop.f32.mrb[0].mxu1 }
 0x306   : > { %864 = vmax.xlane.f32.xlu1 %v2642_v58  ;;  %v2645_v18 = vpop.f32.mrb[1].mxu1 }
 0x307   : > { %860 = vmax.xlane.f32.xlu0 %v2645_v18  ;;  %v2648_v19 = vpop.f32.mrb[2].mxu1 }
 0x308   : > { %v2650_v20 = vpop.f32.mrb[3].mxu1 }
 0x30a   : > { %866 = vmax.xlane.f32.xlu1 %v2648_v19 }
 0x30b   : > { %862 = vmax.xlane.f32.xlu0 %v2650_v20 }
 0x30d   : > { %v2654_v21 = vpop.f32.mrb[4].mxu1 }
 0x30e   : > { %v2656_v22 = vpop.f32.mrb[5].mxu1 }
 0x30f   : > { %868 = vmax.xlane.f32.xlu0 %v2656_v22  ;;  %v2659_v23 = vpop.f32.mrb[6].mxu1 }
 0x310   : > { %874 = vmax.xlane.f32.xlu1 %v2659_v23  ;;  %v2662_v24 = vpop.f32.mrb[7].mxu1 }
 0x313   : > { %872 = vmax.xlane.f32.xlu0 %v2654_v21 }
 0x314   : > { %870 = vmax.xlane.f32.xlu1 %v2662_v24 }
 0x315   : > { %v2666_v25 = vpop.f32.mrb[8].mxu1 }
 0x316   : > { %v2668_v26 = vpop.f32.mrb[9].mxu1 }
 0x317   : > { %v2670_v27 = vpop.f32.mrb[10].mxu1  ;;  %876 = vmax.xlane.f32.xlu0 %v2668_v26 }
 0x318   : > { %882 = vmax.xlane.f32.xlu1 %v2670_v27  ;;  %v2674_v28 = vpop.f32.mrb[11].mxu1 }
 0x31b   : > { %880 = vmax.xlane.f32.xlu0 %v2666_v25 }
 0x31c   : > { %878 = vmax.xlane.f32.xlu1 %v2674_v28 }
 0x31d   : > { %v2678_v29 = vpop.f32.mrb[12].mxu1 }
 0x31e   : > { %v2680_v30 = vpop.f32.mrb[13].mxu1 }
 0x31f   : > { %v2682_v31 = vpop.f32.mrb[14].mxu1  ;;  %884 = vmax.xlane.f32.xlu0 %v2680_v30 }
 0x320   : > { %890 = vmax.xlane.f32.xlu1 %v2682_v31  ;;  %v2686_v32 = vpop.f32.mrb[15].mxu1 }
 0x323   : > { %888 = vmax.xlane.f32.xlu0 %v2678_v29 }
 0x324   : > { %886 = vmax.xlane.f32.xlu1 %v2686_v32 }
 0x393   : > { %v865_v35 = vpop.xlane.xlu1 %864 }
 0x394   : > { %v2693_v36 = vmax.f32 %v2690_v33, %v865_v35  ;;  %v861_v37 = vpop.xlane.xlu0 %860 }
 0x395   : > { %v892_v38 = vmax.f32 %v844_v34, %v861_v37 }
 0x396   : > { %1432 = vst.msk [vmem:[#allocation3 + $0x10] sm:$0xff] %vm1164_vm3, %v2693_v36  ;;  %968 = vperm.xlu1 %2144, %v2693_v36  }
 0x397   : > { %1430 = vst.msk [vmem:[#allocation3] sm:$0xff] %vm1164_vm3, %v892_v38  ;;  %v867_v41 = vpop.xlane.xlu1 %866  ;;  %958 = vperm.xlu0 %2143, %v892_v38   ;;  %v908_v4 = vsub.f32 %v844_v34, %v892_v38 }
 0x398   : > { %v895_v42 = vmax.f32 %v2695_v39, %v867_v41  ;;  %v863_v43 = vpop.xlane.xlu0 %862 }
 0x399   : > { %v2705_v44 = vmax.f32 %v2700_v40, %v863_v43  ;;  %v924_v11 = vmul.f32 1.442695, %v908_v4  ;;  %v910_v43 = vsub.f32 %v2690_v33, %v2693_v36 }
 0x39a   : > { %1433 = vst.msk [vmem:[#allocation3 + $0x18] sm:$0xff] %vm1164_vm3, %v895_v42  ;;  %973 = vperm.xlu1 %2144, %v895_v42   ;;  %v911_v12 = vsub.f32 %v2695_v39, %v895_v42 }
 0x39b   : > { %1431 = vst.msk [vmem:[#allocation3 + $0x8] sm:$0xff] %vm1164_vm3, %v2705_v44  ;;  %v909_v17 = vsub.f32 %v2700_v40, %v2705_v44  ;;  %2151 = vpow2.f32 %v924_v11 }
 0x39c   : > { %v869_v47 = vpop.xlane.xlu0 %868  ;;  %v930_v37 = vmul.f32 1.442695, %v911_v12 }
 0x39d   : > { %v2715_v48 = vmax.f32 %v2708_v45, %v869_v47  ;;  %v875_v49 = vpop.xlane.xlu1 %874 }
 0x39e   : > { %v2718_v50 = vmax.f32 %v2712_v46, %v875_v49  ;;  %963 = vperm.xlu1 %2144, %v2705_v44   ;;  %v926_v44 = vmul.f32 1.442695, %v909_v17  ;;  %2153 = vpow2.f32 %v930_v37 }
 0x39f   : > { %1434 = vst.msk [vmem:[#allocation3 + $0x20] sm:$0xff] %vm1164_vm3, %v2715_v48 }
 0x3a0   : > { %1437 = vst.msk [vmem:[#allocation3 + $0x38] sm:$0xff] %vm1164_vm3, %v2718_v50  ;;  %v873_v53 = vpop.xlane.xlu0 %872  ;;  %v915_v47 = vsub.f32 %v2712_v46, %v2718_v50  ;;  %2155 = vpow2.f32 %v926_v44 }
 0x3a1   : > { %v2728_v54 = vmax.f32 %v2721_v51, %v873_v53  ;;  %v871_v55 = vpop.xlane.xlu1 %870  ;;  %v912_v53 = vsub.f32 %v2708_v45, %v2715_v48 }
 0x3a2   : > { %v897_v57 = vmax.f32 %v849_v52, %v871_v55  ;;  %v938_v55 = vmul.f32 1.442695, %v915_v47 }
 0x3a3   : > { %1436 = vst.msk [vmem:[#allocation3 + $0x30] sm:$0xff] %vm1164_vm3, %v2728_v54  ;;  %988 = vperm.xlu1 %2144, %v2728_v54   ;;  %v932_v46 = vmul.f32 1.442695, %v912_v53 }
 0x3a4   : > { %1435 = vst.msk [vmem:[#allocation3 + $0x28] sm:$0xff] %vm1164_vm3, %v897_v57  ;;  %v877_v61 = vpop.xlane.xlu0 %876  ;;  %v913_v38 = vsub.f32 %v849_v52, %v897_v57  ;;  %v928_v52 = vmul.f32 1.442695, %v910_v43 }
 0x3a5   : > { %v883_v62 = vpop.xlane.xlu1 %882  ;;  %v2739_v63 = vmax.f32 %v2730_v59, %v877_v61  ;;  %v2802_v36 = vpop.eup %2151 }
 0x3a6   : > { %v2742_v0 = vmax.f32 %v2735_v60, %v883_v62  ;;  %v934_v49 = vmul.f32 1.442695, %v913_v38 }
 0x3a7   : > { %1438 = vst.msk [vmem:[#allocation3 + $0x40] sm:$0xff] %vm1164_vm3, %v2739_v63  ;;  %978 = vperm.xlu1 %2144, %v2715_v48  }
 0x3a8   : > { %1441 = vst.msk [vmem:[#allocation3 + $0x58] sm:$0xff] %vm1164_vm3, %v2742_v0  ;;  %v881_v3 = vpop.xlane.xlu0 %880  ;;  %2157 = vpow2.f32 %v934_v49  ;;  %v919_v33 = vsub.f32 %v2735_v60, %v2742_v0 }
 0x3a9   : > { %v879_v5 = vpop.xlane.xlu1 %878  ;;  %v2754_v6 = vmax.f32 %v2744_v1, %v881_v3  ;;  %2159 = vpow2.f32 %v928_v52 }
 0x3aa   : > { %v901_v7 = vmax.f32 %v2749_v2, %v879_v5  ;;  %2161 = vpow2.f32 %v938_v55  ;;  %v946_v45 = vmul.f32 1.442695, %v919_v33 }
 0x3ab   : > { %1440 = vst.msk [vmem:[#allocation3 + $0x50] sm:$0xff] %vm1164_vm3, %v2754_v6  ;;  %983 = vperm.xlu1 %2144, %v897_v57   ;;  %v2809_v57 = vpop.eup %2153  ;;  %2163 = vpow2.f32 %v932_v46  ;;  %v918_v61 = vsub.f32 %v2744_v1, %v2754_v6 }
 0x3ac   : > { %1439 = vst.msk [vmem:[#allocation3 + $0x48] sm:$0xff] %vm1164_vm3, %v901_v7  ;;  %1003 = vperm.xlu0 %2143, %v901_v7   ;;  %v885_v10 = vpop.xlane.xlu0 %884  ;;  %v917_v48 = vsub.f32 %v2749_v2, %v901_v7  ;;  %2165 = vpow2.f32 %v946_v45  ;;  %v916_v2 = vsub.f32 %v2730_v59, %v2739_v63 }
 0x3ad   : > { %v891_v13 = vpop.xlane.xlu1 %890  ;;  %v2766_v14 = vmax.f32 %v2757_v8, %v885_v10  ;;  %v944_v3 = vmul.f32 1.442695, %v918_v61 }
 0x3ae   : > { %v2769_v15 = vmax.f32 %v2761_v9, %v891_v13  ;;  %v942_v62 = vmul.f32 1.442695, %v917_v48 }
 0x3af   : > { %1442 = vst.msk [vmem:[#allocation3 + $0x60] sm:$0xff] %vm1164_vm3, %v2766_v14  ;;  %993 = vperm.xlu1 %2144, %v2718_v50   ;;  %v914_v50 = vsub.f32 %v2721_v51, %v2728_v54  ;;  %v2815_v54 = vpop.eup %2155  ;;  %v920_v7 = vsub.f32 %v2757_v8, %v2766_v14 }
 0x3b0   : > { %v923_v34 = vsub.f32 %v2761_v9, %v2769_v15  ;;  %1445 = vst.msk [vmem:[#allocation3 + $0x78] sm:$0xff] %vm1164_vm3, %v2769_v15  ;;  %1013 = vperm.xlu0 %2143, %v2742_v0   ;;  %v889_v35 = vpop.xlane.xlu0 %888 }
 0x3b1   : > { %v887_v39 = vpop.xlane.xlu1 %886  ;;  %v2784_v41 = vmax.f32 %v2771_v56, %v889_v35  ;;  %v936_v60 = vmul.f32 1.442695, %v914_v50  ;;  %v948_v10 = vmul.f32 1.442695, %v920_v7 }
 0x3b2   : > { %v905_v42 = vmax.f32 %v857_v16, %v887_v39  ;;  %v2817_v0 = vpop.eup %2157 }
 0x3b3   : > { %v922_v40 = vsub.f32 %v2771_v56, %v2784_v41  ;;  %1444 = vst.msk [vmem:[#allocation3 + $0x70] sm:$0xff] %vm1164_vm3, %v2784_v41  ;;  %998 = vperm.xlu1 %2144, %v2739_v63   ;;  %2167 = vpow2.f32 %v936_v60  ;;  %v2823_v4 = vpop.eup %2159 }
 0x3b4   : > { %1443 = vst.msk [vmem:[#allocation3 + $0x68] sm:$0xff] %vm1164_vm3, %v905_v42  ;;  %1023 = vperm.xlu0 %2143, %v905_v42   ;;  %v921_v51 = vsub.f32 %v857_v16, %v905_v42  ;;  %2169 = vpow2.f32 %v942_v62  ;;  %v2825_v5 = vpop.eup %2161 }
 0x3b5   : > { %2171 = vpow2.f32 %v944_v3  ;;  %v2831_v59 = vpop.eup %2163 }
 0x3b6   : > { %v950_v1 = vmul.f32 1.442695, %v921_v51  ;;  %v2833_v63 = vpop.eup %2165 }
 0x3b7   : > { %1008 = vperm.xlu1 %2144, %v2754_v6   ;;  %v940_v6 = vmul.f32 1.442695, %v916_v2 }
 0x3b8   : > { %1033 = vperm.xlu0 %2143, %v2769_v15   ;;  %2173 = vpow2.f32 %v950_v1 }
 0x3b9   : > { %2175 = vpow2.f32 %v940_v6 }
 0x3ba   : > { %2177 = vpow2.f32 %v948_v10 }
 0x3bb   : > { %1018 = vperm.xlu1 %2144, %v2766_v14  }
 0x3bc   : > { %1199 = vperm.xlu0 %2143, %v2802_v36  }
 0x3bd   : > { %v2837_v11 = vpop.eup %2167 }
 0x3be   : > { %v2839_v12 = vpop.eup %2169 }
 0x3bf   : > { %1028 = vperm.xlu1 %2144, %v2784_v41   ;;  %v2843_v8 = vpop.eup %2171 }
 0x3c0   : > { %1214 = vperm.xlu0 %2143, %v2809_v57  }
 0x3c2   : > { %v2845_v13 = vpop.eup %2173 }
 0x3c3   : > { %1204 = vperm.xlu1 %2144, %v2815_v54   ;;  %v2849_v14 = vpop.eup %2175 }
 0x3c4   : > { %1224 = vperm.xlu0 %2143, %v2817_v0   ;;  %v2852_v16 = vpop.eup %2177 }
 0x3c7   : > { %1209 = vperm.xlu1 %2144, %v2823_v4  }
 0x3c8   : > { %1234 = vperm.xlu0 %2143, %v2825_v5  }
 0x3cb   : > { %1219 = vperm.xlu1 %2144, %v2831_v59  }
 0x3cc   : > { %1254 = vperm.xlu0 %2143, %v2833_v63  }
 0x3cf   : > { %1229 = vperm.xlu1 %2144, %v2837_v11  }
 0x3d0   : > { %1244 = vperm.xlu0 %2143, %v2839_v12  }
 0x3d3   : > { %1249 = vperm.xlu1 %2144, %v2843_v8  }
 0x3d4   : > { %1264 = vperm.xlu0 %2143, %v2845_v13  }
 0x3d7   : > { %1239 = vperm.xlu1 %2144, %v2849_v14  }
 0x3db   : > { %1259 = vperm.xlu1 %2144, %v2852_v16  }
 0x415   : > { %v969_v17 = vpop.permute.xlu1 %968 }
 0x416   : > { %v1038_v35 = vsub.f32 %v2642_v58, %v969_v17  ;;  %v959_v37 = vpop.permute.xlu0 %958 }
 0x417   : > { %v1036_v38 = vsub.f32 %v2645_v18, %v959_v37 }
 0x418   : > { %v1056_v39 = vmul.f32 1.442695, %v1038_v35 }
 0x419   : > { %v1052_v42 = vmul.f32 1.442695, %v1036_v38  ;;  %v974_v43 = vpop.permute.xlu1 %973 }
 0x41a   : > { %2179 = vpow2.f32 %v1056_v39  ;;  %v1039_v44 = vsub.f32 %v2648_v19, %v974_v43 }
 0x41b   : > { %2181 = vpow2.f32 %v1052_v42 }
 0x41c   : > { %v1058_v47 = vmul.f32 1.442695, %v1039_v44 }
 0x41d   : > { %v964_v49 = vpop.permute.xlu1 %963 }
 0x41e   : > { %2183 = vpow2.f32 %v1058_v47  ;;  %v1037_v52 = vsub.f32 %v2650_v20, %v964_v49 }
 0x420   : > { %v1054_v53 = vmul.f32 1.442695, %v1037_v52 }
 0x422   : > { %2185 = vpow2.f32 %v1054_v53  ;;  %v989_v55 = vpop.permute.xlu1 %988 }
 0x423   : > { %v1042_v58 = vsub.f32 %v2654_v21, %v989_v55 }
 0x424   : > { %v2180_v33 = vpop.eup %2179 }
 0x425   : > { %v2182_v46 = vpop.eup %2181  ;;  %v1064_v18 = vmul.f32 1.442695, %v1042_v58  ;;  %1120 = vadd.xlane.f32.xlu0 %v2180_v33 }
 0x426   : > { %1116 = vadd.xlane.f32.xlu1 %v2182_v46  ;;  %v979_v50 = vpop.permute.xlu1 %978 }
 0x427   : > { %2187 = vpow2.f32 %v1064_v18  ;;  %v1040_v19 = vsub.f32 %v2656_v22, %v979_v50 }
 0x428   : > { %v2184_v45 = vpop.eup %2183 }
 0x429   : > { %v1060_v48 = vmul.f32 1.442695, %v1040_v19  ;;  %v1294_v60 = vpack.c.bf16 %v2184_v45, %v2180_v33 }
 0x42a   : > { %1122 = vadd.xlane.f32.xlu1 %v2184_v45  ;;  %v984_v61 = vpop.permute.xlu1 %983 }
 0x42b   : > { %2189 = vpow2.f32 %v1060_v48  ;;  %v1041_v20 = vsub.f32 %v2662_v24, %v984_v61  ;;  %v1004_v62 = vpop.permute.xlu0 %1003 }
 0x42c   : > { %v2186_v51 = vpop.eup %2185  ;;  %v1045_v3 = vsub.f32 %v2674_v28, %v1004_v62 }
 0x42d   : > { %v1062_v21 = vmul.f32 1.442695, %v1041_v20  ;;  %1118 = vadd.xlane.f32.xlu0 %v2186_v51  ;;  %v1293_v2 = vpack.c.bf16 %v2186_v51, %v2182_v46 }
 0x42e   : > { %v994_v1 = vpop.permute.xlu1 %993  ;;  %v1070_v17 = vmul.f32 1.442695, %v1045_v3  ;;  %v952_v3 = vmul.f32 1.442695, %v922_v40 }
 0x42f   : > { %2191 = vpow2.f32 %v1062_v21  ;;  %v1043_v6 = vsub.f32 %v2659_v23, %v994_v1  ;;  %v1014_v22 = vpop.permute.xlu0 %1013  ;;  %2028 = vmatprep.mubr.bf16.mxu0 %v1293_v2  ;;  %v954_v1 = vmul.f32 1.442695, %v923_v34 }
 0x430   : > { %2029 = vmatmul.mubr.bf16.vlgmr.msra.gmra.mrb[32].mxu0 %v1294_v60  ;;  %v1047_v35 = vsub.f32 %v2670_v27, %v1014_v22 }
 0x431   : > { %v2188_v7 = vpop.eup %2187  ;;  %v1066_v10 = vmul.f32 1.442695, %v1043_v6 }
 0x432   : > { %1128 = vadd.xlane.f32.xlu0 %v2188_v7  ;;  %v999_v24 = vpop.permute.xlu1 %998  ;;  %v1074_v42 = vmul.f32 1.442695, %v1047_v35 }
 0x433   : > { %2193 = vpow2.f32 %v1066_v10  ;;  %v1044_v37 = vsub.f32 %v2668_v26, %v999_v24  ;;  %v1024_v38 = vpop.permute.xlu0 %1023 }
 0x434   : > { %2195 = vpow2.f32 %v1070_v17  ;;  %v1049_v23 = vsub.f32 %v2686_v32, %v1024_v38 }
 0x435   : > { %v2190_v39 = vpop.eup %2189  ;;  %v1068_v28 = vmul.f32 1.442695, %v1044_v37 }
 0x436   : > { %1124 = vadd.xlane.f32.xlu0 %v2190_v39  ;;  %v1009_v43 = vpop.permute.xlu1 %1008  ;;  %v1078_v52 = vmul.f32 1.442695, %v1049_v23 }
 0x437   : > { %2197 = vpow2.f32 %v1068_v28  ;;  %v1046_v44 = vsub.f32 %v2666_v25, %v1009_v43  ;;  %v1034_v47 = vpop.permute.xlu0 %1033 }
 0x438   : > { %2199 = vpow2.f32 %v1074_v42  ;;  %v1051_v53 = vsub.f32 %v2682_v31, %v1034_v47  ;;  %v1084_v42 = vld [vmem:[#allocation4] sm:$0xff] }
 0x439   : > { %v2192_v49 = vpop.eup %2191  ;;  %v1072_v27 = vmul.f32 1.442695, %v1046_v44  ;;  %v1100_v44 = vmul.f32 %v2802_v36, %v1084_v42  ;;  %v1090_v36 = vld [vmem:[#allocation4 + $0x30] sm:$0xff] }
 0x43a   : > { %v1019_v26 = vpop.permute.xlu1 %1018  ;;  %v1295_v55 = vpack.c.bf16 %v2192_v49, %v2190_v39  ;;  %v1082_v46 = vmul.f32 1.442695, %v1051_v53  ;;  %v1086_v39 = vld [vmem:[#allocation4 + $0x10] sm:$0xff] }
 0x43b   : > { %2201 = vpow2.f32 %v1072_v27  ;;  %v1048_v58 = vsub.f32 %v2680_v30, %v1019_v26  ;;  %v1102_v23 = vmul.f32 %v2823_v4, %v1086_v39  ;;  %v1087_v27 = vld [vmem:[#allocation4 + $0x18] sm:$0xff]  ;;  %v1085_v26 = vld [vmem:[#allocation4 + $0x8] sm:$0xff] }
 0x43c   : > { %2032 = vmatprep.mubr.bf16.mxu0 %v1295_v55  ;;  %2203 = vpow2.f32 %v1078_v52  ;;  %v1103_v53 = vmul.f32 %v2809_v57, %v1087_v27 }
 0x43d   : > { %v2194_v33 = vpop.eup %2193  ;;  %v1076_v32 = vmul.f32 1.442695, %v1048_v58 }
 0x43e   : > { %1130 = vadd.xlane.f32.xlu1 %v2194_v33  ;;  %v1029_v18 = vpop.permute.xlu1 %1028  ;;  %v1296_v25 = vpack.c.bf16 %v2194_v33, %v2188_v7  ;;  %v2196_v19 = vpop.eup %2195  ;;  %v1101_v33 = vmul.f32 %v2815_v54, %v1085_v26  ;;  %v1091_v54 = vld [vmem:[#allocation4 + $0x38] sm:$0xff]  ;;  %v1096_v26 = vld [vmem:[#allocation4 + $0x60] sm:$0xff] }
 0x43f   : > { %2205 = vpow2.f32 %v1076_v32  ;;  %v1050_v50 = vsub.f32 %v2678_v29, %v1029_v18  ;;  %v2883_v7 = vpop.permute.xlu0 %1199 }
 0x440   : > { %2033 = vmatmul.mubr.bf16.gmra.mrb[36].mxu0 %v1296_v25  ;;  %2207 = vpow2.f32 %v1082_v46  ;;  %v1106_v46 = vmul.f32 %v2837_v11, %v1090_v36  ;;  %v1088_v25 = vld [vmem:[#allocation4 + $0x20] sm:$0xff] }
 0x441   : > { %v2198_v45 = vpop.eup %2197  ;;  %v1080_v31 = vmul.f32 1.442695, %v1050_v50  ;;  %v1104_v57 = vmul.f32 %v2831_v59, %v1088_v25  ;;  %v1182_v25 = vld [vmem:[#allocation5 + $0x8] sm:$0xff] }
 0x442   : > { %1126 = vadd.xlane.f32.xlu1 %v2192_v49  ;;  %v1297_v48 = vpack.c.bf16 %v2196_v19, %v2198_v45  ;;  %v2200_v30 = vpop.eup %2199  ;;  %v2885_v10 = vpop.permute.xlu1 %1204 }
 0x443   : > { %2209 = vpow2.f32 %v1080_v31  ;;  %v2887_v56 = vpop.permute.xlu0 %1214  ;;  %v1107_v31 = vmul.f32 %v2825_v5, %v1091_v54  ;;  %v1092_v5 = vld [vmem:[#allocation4 + $0x40] sm:$0xff]  ;;  %v1278_v54 = vmul.f32 %v2885_v10, %v1182_v25 }
 0x444   : > { %2036 = vmatprep.mubr.bf16.mxu0 %v1297_v48  ;;  %2211 = vpow2.f32 %v952_v3  ;;  %v1093_v3 = vld [vmem:[#allocation4 + $0x48] sm:$0xff] }
 0x445   : > { %v2202_v60 = vpop.eup %2201  ;;  %2213 = vpow2.f32 %v954_v1  ;;  %v1109_v42 = vmul.f32 %v2839_v12, %v1093_v3 }
 0x446   : > { %1138 = vadd.xlane.f32.xlu1 %v2200_v30  ;;  %1136 = vadd.xlane.f32.xlu0 %v2202_v60  ;;  %v1298_v61 = vpack.c.bf16 %v2200_v30, %v2202_v60  ;;  %v2204_v20 = vpop.eup %2203  ;;  %v2889_v41 = vpop.permute.xlu1 %1209  ;;  %v1089_v30 = vld [vmem:[#allocation4 + $0x28] sm:$0xff] }
 0x447   : > { %v2891_v40 = vpop.permute.xlu0 %1224  ;;  %v1105_v11 = vmul.f32 %v2817_v0, %v1089_v30  ;;  %v1108_v0 = vmul.f32 %v2849_v14, %v1092_v5  ;;  %v1097_v14 = vld [vmem:[#allocation4 + $0x68] sm:$0xff] }
 0x448   : > { %2037 = vmatmul.mubr.bf16.gmra.mrb[40].mxu0 %v1298_v61 }
 0x449   : > { %v2206_v62 = vpop.eup %2205 }
 0x44a   : > { %1134 = vadd.xlane.f32.xlu1 %v2196_v19  ;;  %1132 = vadd.xlane.f32.xlu0 %v2198_v45  ;;  %v1299_v29 = vpack.c.bf16 %v2204_v20, %v2206_v62  ;;  %v2208_v51 = vpop.eup %2207  ;;  %v2893_v9 = vpop.permute.xlu1 %1219 }
 0x44b   : > { %v2895_v15 = vpop.permute.xlu0 %1234 }
 0x44c   : > { %2040 = vmatprep.mubr.bf16.mxu0 %v1299_v29 }
 0x44d   : > { %v2210_v21 = vpop.eup %2209 }
 0x44e   : > { %1146 = vadd.xlane.f32.xlu1 %v2208_v51  ;;  %1144 = vadd.xlane.f32.xlu0 %v2210_v21  ;;  %v1300_v2 = vpack.c.bf16 %v2208_v51, %v2210_v21  ;;  %v2877_v6 = vpop.eup %2211  ;;  %v2897_v34 = vpop.permute.xlu1 %1229 }
 0x44f   : > { %v2880_v22 = vpop.eup %2213  ;;  %v2899_v17 = vpop.permute.xlu0 %1254 }
 0x450   : > { %2041 = vmatmul.mubr.bf16.gmra.mrb[44].mxu0 %v1300_v2 }
 0x452   : > { %1142 = vadd.xlane.f32.xlu1 %v2204_v20  ;;  %1140 = vadd.xlane.f32.xlu0 %v2206_v62  ;;  %v2901_v35 = vpop.permute.xlu1 %1249  ;;  %v1094_v20 = vld [vmem:[#allocation4 + $0x50] sm:$0xff]  ;;  %v1095_v62 = vld [vmem:[#allocation4 + $0x58] sm:$0xff] }
 0x453   : > { %v2903_v24 = vpop.permute.xlu0 %1244  ;;  %v1110_v59 = vmul.f32 %v2843_v8, %v1094_v20  ;;  %v1111_v51 = vmul.f32 %v2833_v63, %v1095_v62  ;;  %v1099_v8 = vld [vmem:[#allocation4 + $0x78] sm:$0xff] }
 0x454   : > { %v1115_v27 = vmul.f32 %v2880_v22, %v1099_v8  ;;  %v1188_v20 = vld [vmem:[#allocation5 + $0x38] sm:$0xff] }
 0x455   : > { %v1284_v10 = vmul.f32 %v2895_v15, %v1188_v20 }
 0x456   : > { %v2905_v37 = vpop.permute.xlu1 %1239 }
 0x457   : > { %v2907_v38 = vpop.permute.xlu0 %1264 }
 0x45a   : > { %v2909_v28 = vpop.permute.xlu1 %1259 }
 0x463   : > { %1269 = vperm.xlu1 %2144, %v2877_v6  }
 0x468   : > { %1274 = vperm.xlu0 %2143, %v2880_v22   ;;  %v1183_v22 = vld [vmem:[#allocation5 + $0x10] sm:$0xff] }
 0x4b2   : > { %v1121_v43 = vpop.xlane.xlu0 %1120 }
 0x4b3   : > { %v1150_v47 = vadd.f32 %v1121_v43, %v1102_v23  ;;  %v1117_v49 = vpop.xlane.xlu1 %1116 }
 0x4b4   : > { %v1148_v52 = vadd.f32 %v1117_v49, %v1100_v44  ;;  %v1098_v44 = vld [vmem:[#allocation4 + $0x70] sm:$0xff] }
 0x4b5   : > { %1167 = vst.msk [vmem:[#allocation4 + $0x10] sm:$0xff] %vm1164_vm3, %v1150_v47  ;;  %v1114_v49 = vmul.f32 %v2877_v6, %v1098_v44 }
 0x4b6   : > { %1165 = vst.msk [vmem:[#allocation4] sm:$0xff] %vm1164_vm3, %v1148_v52 }
 0x4b7   : > { %v1123_v55 = vpop.xlane.xlu1 %1122 }
 0x4b8   : > { %v1151_v58 = vadd.f32 %v1123_v55, %v1103_v53 }
 0x4ba   : > { %1168 = vst.msk [vmem:[#allocation4 + $0x18] sm:$0xff] %vm1164_vm3, %v1151_v58  ;;  %v1119_v4 = vpop.xlane.xlu0 %1118  ;;  %v1112_v58 = vmul.f32 %v2852_v16, %v1096_v26 }
 0x4bb   : > { %v1149_v32 = vadd.f32 %v1119_v4, %v1101_v33  ;;  %v1113_v33 = vmul.f32 %v2845_v13, %v1097_v14 }
 0x4bd   : > { %1166 = vst.msk [vmem:[#allocation4 + $0x8] sm:$0xff] %vm1164_vm3, %v1149_v32 }
 0x4bf   : > { %v1129_v18 = vpop.xlane.xlu0 %1128 }
 0x4c0   : > { %v1154_v50 = vadd.f32 %v1129_v18, %v1106_v46  ;;  %v1181_v46 = vld [vmem:[#allocation5] sm:$0xff]  ;;  %v1184_v18 = vld [vmem:[#allocation5 + $0x18] sm:$0xff] }
 0x4c1   : > { %v1280_v16 = vmul.f32 %v2887_v56, %v1184_v18 }
 0x4c2   : > { %1171 = vst.msk [vmem:[#allocation4 + $0x30] sm:$0xff] %vm1164_vm3, %v1154_v50  ;;  %v1279_v50 = vmul.f32 %v2889_v41, %v1183_v22  ;;  %v1185_v41 = vld [vmem:[#allocation5 + $0x20] sm:$0xff] }
 0x4c3   : > { %v1125_v19 = vpop.xlane.xlu0 %1124  ;;  %v1281_v56 = vmul.f32 %v2893_v9, %v1185_v41  ;;  %v1190_v9 = vld [vmem:[#allocation5 + $0x48] sm:$0xff] }
 0x4c4   : > { %v1152_v45 = vadd.f32 %v1125_v19, %v1104_v57  ;;  %v1277_v57 = vmul.f32 %v2883_v7, %v1181_v46  ;;  %v1186_v7 = vld [vmem:[#allocation5 + $0x28] sm:$0xff] }
 0x4c6   : > { %1169 = vst.msk [vmem:[#allocation4 + $0x20] sm:$0xff] %vm1164_vm3, %v1152_v45 }
 0x4cb   : > { %v1131_v48 = vpop.xlane.xlu1 %1130 }
 0x4cc   : > { %v1155_v60 = vadd.f32 %v1131_v48, %v1107_v31 }
 0x4ce   : > { %1172 = vst.msk [vmem:[#allocation4 + $0x38] sm:$0xff] %vm1164_vm3, %v1155_v60 }
 0x4cf   : > { %v1127_v61 = vpop.xlane.xlu1 %1126 }
 0x4d0   : > { %v1153_v29 = vadd.f32 %v1127_v61, %v1105_v11  ;;  %v1187_v61 = vld [vmem:[#allocation5 + $0x30] sm:$0xff] }
 0x4d1   : > { %v1283_v62 = vmul.f32 %v2897_v34, %v1187_v61  ;;  %v1192_v34 = vld [vmem:[#allocation5 + $0x58] sm:$0xff] }
 0x4d2   : > { %1170 = vst.msk [vmem:[#allocation4 + $0x28] sm:$0xff] %vm1164_vm3, %v1153_v29 }
 0x4d3   : > { %v1137_v21 = vpop.xlane.xlu0 %1136  ;;  %v1139_v2 = vpop.xlane.xlu1 %1138 }
 0x4d4   : > { %v1158_v1 = vadd.f32 %v1137_v21, %v1110_v59  ;;  %v1159_v39 = vadd.f32 %v1139_v2, %v1111_v51  ;;  %v1282_v21 = vmul.f32 %v2891_v40, %v1186_v7  ;;  %v1288_v40 = vmul.f32 %v2899_v17, %v1192_v34 }
 0x4d6   : > { %1175 = vst.msk [vmem:[#allocation4 + $0x50] sm:$0xff] %vm1164_vm3, %v1158_v1  ;;  %1176 = vst.msk [vmem:[#allocation4 + $0x58] sm:$0xff] %vm1164_vm3, %v1159_v39  ;;  %v1191_v39 = vld [vmem:[#allocation5 + $0x50] sm:$0xff] }
 0x4d7   : > { %v1133_v23 = vpop.xlane.xlu0 %1132  ;;  %v1135_v43 = vpop.xlane.xlu1 %1134 }
 0x4d8   : > { %v1156_v47 = vadd.f32 %v1133_v23, %v1108_v0  ;;  %v1157_v63 = vadd.f32 %v1135_v43, %v1109_v42  ;;  %v1189_v42 = vld [vmem:[#allocation5 + $0x40] sm:$0xff]  ;;  %v1287_v23 = vmul.f32 %v2901_v35, %v1191_v39  ;;  %v1196_v35 = vld [vmem:[#allocation5 + $0x78] sm:$0xff] }
 0x4d9   : > { %v1285_v15 = vmul.f32 %v2905_v37, %v1189_v42 }
 0x4da   : > { %1173 = vst.msk [vmem:[#allocation4 + $0x40] sm:$0xff] %vm1164_vm3, %v1156_v47  ;;  %1174 = vst.msk [vmem:[#allocation4 + $0x48] sm:$0xff] %vm1164_vm3, %v1157_v63  ;;  %v1286_v47 = vmul.f32 %v2903_v24, %v1190_v9 }
 0x4db   : > { %v1145_v52 = vpop.xlane.xlu0 %1144  ;;  %v1147_v53 = vpop.xlane.xlu1 %1146 }
 0x4dc   : > { %v1162_v55 = vadd.f32 %v1145_v52, %v1114_v49  ;;  %v1163_v12 = vadd.f32 %v1147_v53, %v1115_v27  ;;  %v1195_v53 = vld [vmem:[#allocation5 + $0x70] sm:$0xff] }
 0x4dd   : > { %v1461_v41 = vld [vmem:[#allocation4 + $0x58] sm:$0xff] (!%p1832_p3)  ;;  %v1460_v7 = vld [vmem:[#allocation4 + $0x50] sm:$0xff] (!%p1832_p3) }
 0x4de   : > { %1179 = vst.msk [vmem:[#allocation4 + $0x70] sm:$0xff] %vm1164_vm3, %v1162_v55  ;;  %1180 = vst.msk [vmem:[#allocation4 + $0x78] sm:$0xff] %vm1164_vm3, %v1163_v12  ;;  %v1193_v55 = vld [vmem:[#allocation5 + $0x60] sm:$0xff]  ;;  %v1194_v12 = vld [vmem:[#allocation5 + $0x68] sm:$0xff] }
 0x4df   : > { %v1141_v4 = vpop.xlane.xlu0 %1140  ;;  %v1143_v32 = vpop.xlane.xlu1 %1142 }
 0x4e0   : > { %v1160_v36 = vadd.f32 %v1141_v4, %v1112_v58  ;;  %v1161_v6 = vadd.f32 %v1143_v32, %v1113_v33  ;;  %v1289_v58 = vmul.f32 %v2909_v28, %v1193_v55  ;;  %v1450_v28 = vld [vmem:[#allocation4] sm:$0xff] (!%p1832_p3) }
 0x4e2   : > { %1177 = vst.msk [vmem:[#allocation4 + $0x60] sm:$0xff] %vm1164_vm3, %v1160_v36  ;;  %1178 = vst.msk [vmem:[#allocation4 + $0x68] sm:$0xff] %vm1164_vm3, %v1161_v6  ;;  %v1290_v36 = vmul.f32 %v2907_v38, %v1194_v12  ;;  %v1451_v38 = vld [vmem:[#allocation4 + $0x8] sm:$0xff] (!%p1832_p3) }
 0x4e3   : > { %v1270_v26 = vpop.permute.xlu1 %1269 }
 0x4e4   : > { %v1291_v17 = vmul.f32 %v1270_v26, %v1195_v53 }
 0x4e7   : > { %v1275_v37 = vpop.permute.xlu0 %1274 }
 0x4e8   : > { %v1292_v24 = vmul.f32 %v1275_v37, %v1196_v35 }
 0x503   : > { %v2030_v19 = vpop.f32.mrb[32].mxu0 }
 0x504   : > { %v1400_v13 = vadd.f32 %v2030_v19, %v1279_v50  ;;  %v1335_v45 = vpop.f32.mrb[33].mxu0  ;;  %v1452_v50 = vld [vmem:[#allocation4 + $0x10] sm:$0xff] (!%p1832_p3)  ;;  %v2364_v19 = vmov (!%p1832_p3), 0  }
 0x505   : > { %v1398_v31 = vadd.f32 %v1335_v45, %v1277_v57  ;;  %v2031_v48 = vpop.f32.mrb[34].mxu0  ;;  %v1453_v57 = vld [vmem:[#allocation4 + $0x18] sm:$0xff] (!%p1832_p3)  ;;  %2216 = vset.pattern.permute.xlu1 (!%p1832_p3), %v2364_v19  ;;  %2215 = vset.pattern.permute.xlu0 (!%p1832_p3), %v2364_v19  ;;  %2217 = vrcp.f32 (!%p1832_p3), %v1452_v50 }
 0x506   : > { %1416 = vst [vmem:[#allocation5 + $0x10] sm:$0xff] %v1400_v13  ;;  %v1401_v30 = vadd.f32 %v2031_v48, %v1280_v16  ;;  %v1338_v60 = vpop.f32.mrb[35].mxu0  ;;  %2219 = vrcp.f32 (!%p1832_p3), %v1450_v28  ;;  %v1455_v16 = vld [vmem:[#allocation4 + $0x28] sm:$0xff] (!%p1832_p3)  ;;  %v1454_v13 = vld [vmem:[#allocation4 + $0x20] sm:$0xff] (!%p1832_p3)  ;;  %v1457_v45 = vld [vmem:[#allocation4 + $0x38] sm:$0xff] (!%p1832_p3) }
 0x507   : > { %1414 = vst [vmem:[#allocation5] sm:$0xff] %v1398_v31  ;;  %v1399_v11 = vadd.f32 %v1338_v60, %v1278_v54  ;;  %2221 = vrcp.f32 (!%p1832_p3), %v1453_v57  ;;  %v1456_v54 = vld [vmem:[#allocation4 + $0x30] sm:$0xff] (!%p1832_p3) }
 0x508   : > { %1417 = vst [vmem:[#allocation5 + $0x18] sm:$0xff] %v1401_v30  ;;  %2223 = vrcp.f32 (!%p1832_p3), %v1451_v38  ;;  %v1459_v30 = vld [vmem:[#allocation4 + $0x48] sm:$0xff] (!%p1832_p3) }
 0x509   : > { %1415 = vst [vmem:[#allocation5 + $0x8] sm:$0xff] %v1399_v11  ;;  %2225 = vrcp.f32 (!%p1832_p3), %v1455_v16  ;;  %v1458_v11 = vld [vmem:[#allocation4 + $0x40] sm:$0xff] (!%p1832_p3) }
 0x50a   : > { %2227 = vrcp.f32 (!%p1832_p3), %v1454_v13 }
 0x50b   : > { %2229 = vrcp.f32 (!%p1832_p3), %v1457_v45 }
 0x50c   : > { %2231 = vrcp.f32 (!%p1832_p3), %v1456_v54 }
 0x50d   : > { %2233 = vrcp.f32 (!%p1832_p3), %v1459_v30 }
 0x50e   : > { %2235 = vrcp.f32 (!%p1832_p3), %v1458_v11 }
 0x50f   : > { %v2218_v31 = vpop.eup (!%p1832_p3), %2217  ;;  %2237 = vrcp.f32 (!%p1832_p3), %v1461_v41 }
 0x510   : > { %v2220_v48 = vpop.eup (!%p1832_p3), %2219  ;;  %1510 = vperm.xlu1 (!%p1832_p3), %2216, %v2218_v31   ;;  %2239 = vrcp.f32 (!%p1832_p3), %v1460_v7 }
 0x511   : > { %v2222_v60 = vpop.eup (!%p1832_p3), %2221  ;;  %1500 = vperm.xlu0 (!%p1832_p3), %2215, %v2220_v48  }
 0x512   : > { %v2224_v61 = vpop.eup (!%p1832_p3), %2223 }
 0x513   : > { %v2034_v29 = vpop.f32.mrb[36].mxu0  ;;  %v2226_v20 = vpop.eup (!%p1832_p3), %2225 }
 0x514   : > { %v1404_v59 = vadd.f32 %v2034_v29, %v1283_v62  ;;  %v1351_v51 = vpop.f32.mrb[37].mxu0  ;;  %1515 = vperm.xlu1 (!%p1832_p3), %2216, %v2222_v60   ;;  %v2228_v62 = vpop.eup (!%p1832_p3), %2227 }
 0x515   : > { %v1402_v2 = vadd.f32 %v1351_v51, %v1281_v56  ;;  %v2035_v5 = vpop.f32.mrb[38].mxu0  ;;  %1505 = vperm.xlu0 (!%p1832_p3), %2215, %v2224_v61   ;;  %v1463_v56 = vld [vmem:[#allocation4 + $0x68] sm:$0xff] (!%p1832_p3)  ;;  %v2230_v29 = vpop.eup (!%p1832_p3), %2229  ;;  %v1465_v51 = vld [vmem:[#allocation4 + $0x78] sm:$0xff] (!%p1832_p3) }
 0x516   : > { %1420 = vst [vmem:[#allocation5 + $0x30] sm:$0xff] %v1404_v59  ;;  %v1405_v3 = vadd.f32 %v2035_v5, %v1284_v10  ;;  %v1354_v1 = vpop.f32.mrb[39].mxu0  ;;  %v1462_v10 = vld [vmem:[#allocation4 + $0x60] sm:$0xff] (!%p1832_p3)  ;;  %v2232_v59 = vpop.eup (!%p1832_p3), %2231  ;;  %2241 = vrcp.f32 (!%p1832_p3), %v1463_v56 }
 0x517   : > { %1418 = vst [vmem:[#allocation5 + $0x20] sm:$0xff] %v1402_v2  ;;  %v1403_v0 = vadd.f32 %v1354_v1, %v1282_v21  ;;  %2243 = vrcp.f32 (!%p1832_p3), %v1462_v10  ;;  %v2234_v21 = vpop.eup (!%p1832_p3), %2233  ;;  %v1464_v2 = vld [vmem:[#allocation4 + $0x70] sm:$0xff] (!%p1832_p3) }
 0x518   : > { %1421 = vst [vmem:[#allocation5 + $0x38] sm:$0xff] %v1405_v3  ;;  %1525 = vperm.xlu1 (!%p1832_p3), %2216, %v2226_v20   ;;  %v2236_v5 = vpop.eup (!%p1832_p3), %2235  ;;  %2245 = vrcp.f32 (!%p1832_p3), %v1465_v51 }
 0x519   : > { %1419 = vst [vmem:[#allocation5 + $0x28] sm:$0xff] %v1403_v0  ;;  %1520 = vperm.xlu0 (!%p1832_p3), %2215, %v2228_v62   ;;  %2247 = vrcp.f32 (!%p1832_p3), %v1464_v2  ;;  %v2238_v3 = vpop.eup (!%p1832_p3), %2237 }
 0x51a   : > { %v2240_v1 = vpop.eup (!%p1832_p3), %2239 }
 0x51b   : > { %v2038_v43 = vpop.f32.mrb[40].mxu0 }
 0x51c   : > { %v1408_v44 = vadd.f32 %v2038_v43, %v1287_v23  ;;  %v1367_v8 = vpop.f32.mrb[41].mxu0  ;;  %1535 = vperm.xlu1 (!%p1832_p3), %2216, %v2230_v29   ;;  %v1485_v43 = vld [vmem:[#allocation5 + $0x18] sm:$0xff] (!%p1832_p3) }
 0x51d   : > { %v1406_v63 = vadd.f32 %v1367_v8, %v1285_v15  ;;  %v2039_v49 = vpop.f32.mrb[42].mxu0  ;;  %1530 = vperm.xlu0 (!%p1832_p3), %2215, %v2232_v59   ;;  %v1484_v15 = vld [vmem:[#allocation5 + $0x10] sm:$0xff] (!%p1832_p3) }
 0x51e   : > { %1424 = vst [vmem:[#allocation5 + $0x50] sm:$0xff] %v1408_v44  ;;  %v1409_v27 = vadd.f32 %v2039_v49, %v1288_v40  ;;  %v1370_v52 = vpop.f32.mrb[43].mxu0  ;;  %v1482_v40 = vld [vmem:[#allocation5] sm:$0xff] (!%p1832_p3)  ;;  %v1483_v44 = vld [vmem:[#allocation5 + $0x8] sm:$0xff] (!%p1832_p3) }
 0x51f   : > { %1422 = vst [vmem:[#allocation5 + $0x40] sm:$0xff] %v1406_v63  ;;  %v1407_v14 = vadd.f32 %v1370_v52, %v1286_v47 }
 0x520   : > { %1425 = vst [vmem:[#allocation5 + $0x58] sm:$0xff] %v1409_v27  ;;  %1545 = vperm.xlu1 (!%p1832_p3), %2216, %v2234_v21   ;;  %v2242_v39 = vpop.eup (!%p1832_p3), %2241  ;;  %v1487_v53 = vld [vmem:[#allocation5 + $0x28] sm:$0xff] (!%p1832_p3) }
 0x521   : > { %1423 = vst [vmem:[#allocation5 + $0x48] sm:$0xff] %v1407_v14  ;;  %1540 = vperm.xlu0 (!%p1832_p3), %2215, %v2236_v5   ;;  %v2244_v0 = vpop.eup (!%p1832_p3), %2243  ;;  %v1486_v14 = vld [vmem:[#allocation5 + $0x20] sm:$0xff] (!%p1832_p3) }
 0x522   : > { %v2246_v42 = vpop.eup (!%p1832_p3), %2245 }
 0x523   : > { %v2042_v33 = vpop.f32.mrb[44].mxu0  ;;  %1449 = sbr.rel (%p1832_p3) target bundleno = 1458 (0x5b2), region = 44  ;;  %v2248_v34 = vpop.eup (!%p1832_p3), %2247 }
 0x524   : > { %v1412_v4 = vadd.f32 %v2042_v33, %v1291_v17  ;;  %v1383_v32 = vpop.f32.mrb[45].mxu0  ;;  %1555 = vperm.xlu1 (!%p1832_p3), %2216, %v2238_v3   ;;  %v1488_v33 = vld [vmem:[#allocation5 + $0x30] sm:$0xff] (!%p1832_p3) }
 0x525   : > { %v1410_v6 = vadd.f32 %v1383_v32, %v1289_v58  ;;  %v2043_v22 = vpop.f32.mrb[46].mxu0  ;;  %1550 = vperm.xlu0 (!%p1832_p3), %2215, %v2240_v1   ;;  %v1489_v58 = vld [vmem:[#allocation5 + $0x38] sm:$0xff] (!%p1832_p3)  ;;  %v1492_v38 = vld [vmem:[#allocation5 + $0x50] sm:$0xff] (!%p1832_p3) }
 0x526   : > { %1428 = vst [vmem:[#allocation5 + $0x70] sm:$0xff] %v1412_v4  ;;  %v1413_v46 = vadd.f32 %v2043_v22, %v1292_v24  ;;  %v1386_v18 = vpop.f32.mrb[47].mxu0 }
 0x527   : > { %1426 = vst [vmem:[#allocation5 + $0x60] sm:$0xff] %v1410_v6  ;;  %v1411_v25 = vadd.f32 %v1386_v18, %v1290_v36  ;;  %v1493_v19 = vld [vmem:[#allocation5 + $0x58] sm:$0xff] (!%p1832_p3) }
 0x528   : > { %1429 = vst [vmem:[#allocation5 + $0x78] sm:$0xff] %v1413_v46  ;;  %1565 = vperm.xlu1 (!%p1832_p3), %2216, %v2242_v39   ;;  %v1491_v22 = vld [vmem:[#allocation5 + $0x48] sm:$0xff] (!%p1832_p3)  ;;  %v1490_v46 = vld [vmem:[#allocation5 + $0x40] sm:$0xff] (!%p1832_p3) }
 0x529   : > { %1427 = vst [vmem:[#allocation5 + $0x68] sm:$0xff] %v1411_v25  ;;  %1560 = vperm.xlu0 (!%p1832_p3), %2215, %v2244_v0  }
 0x52c   : > { %1575 = vperm.xlu1 %2216, %v2246_v42  }
 0x52d   : > { %1570 = vperm.xlu0 %2215, %v2248_v34   ;;  %v1496_v62 = vld [vmem:[#allocation5 + $0x70] sm:$0xff] }
 0x52e   : > { %v1494_v30 = vld [vmem:[#allocation5 + $0x60] sm:$0xff] }
 0x52f   : > { %v1497_v7 = vld [vmem:[#allocation5 + $0x78] sm:$0xff] }
 0x530   : > { %v1495_v48 = vld [vmem:[#allocation5 + $0x68] sm:$0xff] }
 0x58f   : > { %v1511_v9 = vpop.permute.xlu1 %1510 }
 0x590   : > { %v1501_v23 = vpop.permute.xlu0 %1500  ;;  %v1580_v47 = vmul.f32 %v1511_v9, %v1484_v15 }
 0x591   : > { %v1578_v27 = vmul.f32 %v1501_v23, %v1482_v40 }
 0x593   : > { %v1516_v8 = vpop.permute.xlu1 %1515 }
 0x594   : > { %v1581_v63 = vmul.f32 %v1516_v8, %v1485_v43  ;;  %v1506_v49 = vpop.permute.xlu0 %1505 }
 0x595   : > { %v1579_v52 = vmul.f32 %v1506_v49, %v1483_v44 }
 0x596   : > { %v1879_v26 = vpack.c.bf16 %v1581_v63, %v1580_v47 }
 0x597   : > { %v1874_v55 = vpack.c.bf16 %v1579_v52, %v1578_v27  ;;  %v1526_v35 = vpop.permute.xlu1 %1525 }
 0x598   : > { %1911 = vst [vmem:[%s2499_s21 + $0x8] sm:$0xff] %v1879_v26   ;;  %v1583_v37 = vmul.f32 %v1526_v35, %v1487_v53  ;;  %v1521_v12 = vpop.permute.xlu0 %1520 }
 0x599   : > { %1875 = vst [vmem:[%s2499_s21] sm:$0xff] %v1874_v55   ;;  %v1582_v17 = vmul.f32 %v1521_v12, %v1486_v14 }
 0x59b   : > { %v1884_v24 = vpack.c.bf16 %v1583_v37, %v1582_v17  ;;  %v1536_v4 = vpop.permute.xlu1 %1535 }
 0x59c   : > { %v1585_v32 = vmul.f32 %v1536_v4, %v1489_v58  ;;  %v1531_v36 = vpop.permute.xlu0 %1530 }
 0x59d   : > { %1912 = vst [vmem:[%s2499_s21 + $0x10] sm:$0xff] %v1884_v24   ;;  %v1584_v6 = vmul.f32 %v1531_v36, %v1488_v33 }
 0x59f   : > { %v1889_v18 = vpack.c.bf16 %v1585_v32, %v1584_v6  ;;  %v1546_v25 = vpop.permute.xlu1 %1545 }
 0x5a0   : > { %v1587_v50 = vmul.f32 %v1546_v25, %v1491_v22  ;;  %v1541_v28 = vpop.permute.xlu0 %1540 }
 0x5a1   : > { %1913 = vst [vmem:[%s2499_s21 + $0x18] sm:$0xff] %v1889_v18   ;;  %v1586_v57 = vmul.f32 %v1541_v28, %v1490_v46 }
 0x5a3   : > { %v1894_v16 = vpack.c.bf16 %v1587_v50, %v1586_v57  ;;  %v1556_v13 = vpop.permute.xlu1 %1555 }
 0x5a4   : > { %v1589_v45 = vmul.f32 %v1556_v13, %v1493_v19  ;;  %v1551_v54 = vpop.permute.xlu0 %1550 }
 0x5a5   : > { %1914 = vst [vmem:[%s2499_s21 + $0x20] sm:$0xff] %v1894_v16   ;;  %v1588_v31 = vmul.f32 %v1551_v54, %v1492_v38 }
 0x5a7   : > { %v1899_v60 = vpack.c.bf16 %v1589_v45, %v1588_v31  ;;  %v1566_v11 = vpop.permute.xlu1 %1565 }
 0x5a8   : > { %v1591_v61 = vmul.f32 %v1566_v11, %v1495_v48  ;;  %v1561_v41 = vpop.permute.xlu0 %1560 }
 0x5a9   : > { %1915 = vst [vmem:[%s2499_s21 + $0x28] sm:$0xff] %v1899_v60   ;;  %v1590_v20 = vmul.f32 %v1561_v41, %v1494_v30 }
 0x5ab   : > { %v1904_v56 = vpack.c.bf16 %v1591_v61, %v1590_v20  ;;  %v1576_v29 = vpop.permute.xlu1 %1575 }
 0x5ac   : > { %v1593_v10 = vmul.f32 %v1576_v29, %v1497_v7  ;;  %v1571_v59 = vpop.permute.xlu0 %1570 }
 0x5ad   : > { %1916 = vst [vmem:[%s2499_s21 + $0x30] sm:$0xff] %v1904_v56   ;;  %v1592_v51 = vmul.f32 %v1571_v59, %v1496_v62 }
 0x5af   : > { %v1909_v21 = vpack.c.bf16 %v1593_v10, %v1592_v51 }
 0x5b1   : > { %1917 = vst [vmem:[%s2499_s21 + $0x38] sm:$0xff] %v1909_v21  }
 0x5b2 PF: > { %s1851_s18 = sshll.u32 %s2343_s20, 5  ;;  %s1690_s29 = sshll.u32 %s2499_s21, 4  ;;  %s2969_s29 = int_to_ptr.vmem [resolvable:$true] %s1690_s29 }
 0x5b3   : > { %s1687_s11 = sadd.s32 %s1851_s18, %s2480_s12  ;;  %s3055_s28 = sand.u32 1, %s2327_s16  }
 0x5b4   : > { %s1852_s26 = sshll.u32 %s1687_s11, 6  ;;  %s2978_s13 = scalar_lea.sflag [#allocation7], %s3055_s28 }
 0x5b5   : > { %s2974_s27 = scalar_lea.hbm %s3040_s4, %s1852_s26  ;;  %s2249_s6 = scalar_lea.vmem %s2969_s29, 1024 }
 0x5b6   : > { %p2250_p4 = scmp.ne.s32.totalorder %s2969_s29, %s2249_s6  ;;  %s2365_s20 = smov [#allocation6]  }
 0x5b7   : > { %s2253_s21 = sshll.u32 %s2365_s20, 4  ;;  %s2254_s21 = int_to_ptr.vmem [resolvable:$false] %s2253_s21 }
 0x5b8   : > { %p2251_p5 = pnand %p2250_p4, %p2455_p6  ;;  %s2255_s12 = scalar_lea.vmem %s2254_s21, 2048 }
 0x5b9   : > { %p2256_p9 = scmp.lt.s32.totalorder %s2969_s29, %s2254_s21  ;;  %p2257_p10 = scmp.lt.s32.totalorder %s2255_s12, %s2249_s6 }
 0x5ba   : > { %p2252_p8 = pneg %p2251_p5 }
 0x5bb   : > { %p2258_p11 = por %p2257_p10, %p2256_p9 }
 0x5bd   : > { %p2259_p12 = pnand %p2258_p11, %p2252_p8 }
 0x5bf   : > { %2262 = shalt.err (!%p2259_p12)
}
 0x5c0   : > { %s2263_s7 = scalar_lea.hbm %s2974_s27, 1024  ;;  %s2267_s19 = scalar_lea.hbm %s3040_s4, 4096 }
 0x5c1   : > { %p2264_p13 = scmp.ne.s32.totalorder %s2974_s27, %s2263_s7  ;;  %p2268_p2 = scmp.lt.u32.totalorder %s2974_s27, %s3040_s4 }
 0x5c2   : > { %p2269_p3 = scmp.lt.u32.totalorder %s2267_s19, %s2263_s7  ;;  %p2271_p5 = scmp.lt.u32.totalorder %s2263_s7, %s2974_s27 }
 0x5c3   : > { %p2265_p0 = pnand %p2264_p13, %p2455_p6 }
 0x5c4   : > { %p2270_p4 = por %p2269_p3, %p2268_p2 }
 0x5c5   : > { %p2266_p1 = pneg %p2265_p0 }
 0x5c6   : > { %p2272_p8 = por %p2271_p5, %p2270_p4 }
 0x5c8   : > { %p2273_p9 = pnand %p2272_p8, %p2266_p1 }
 0x5ca   : > { %2276 = shalt.err (!%p2273_p9)
}
 0x5cb   : > { %s2366_s18 = smov 64   ;;  %s2367_s11 = smov 4  }
 0x5cc   : > { %2048 = dma.vmem_to_hbm [thread:$0]  (%p2455_p6), %s2969_s29, 1024, %s2974_s27, %s2978_s13, %s2366_s18, %s2366_s18, %s2367_s11  }
 0x5cd PF: > { %p2054_p10 = scmp.ge.s32.totalorder %s2359_s24, 2  ;;  %s1705_s26 = sand.u32 1, %s2323_s15  }
 0x5ce   : > { %s1706_s22 = scalar_lea.sflag [#allocation7], %s1705_s26 }
 0x5cf   : > { %p2051_p11 = pnand %p2054_p10, %p2462_p7 }
 0x5d1   : > { %2318 = dma.done.wait (!%p2051_p11), %s1706_s22, 1024  }
 0x5d2   : > { %2320 = vsyncadd (!%p2051_p11), %s1706_s22, 4294966272  ;;  %s17_s24 = sadd.s32 1, %s2359_s24   ;;  %s3056_s18 = sld [smem:[#allocation9_spill]] }
 0x5d3   : > { %p14_p12 = scmp.ge.s32.totalorder %s17_s24, 10   ;;  %s3057_s19 = sld [smem:[#allocation10_spill]] }
 0x5d4   : > { %s3058_s20 = sld [smem:[#allocation11_spill]]  ;;  %s3059_s21 = sld [smem:[#allocation12_spill]] }
 0x5d5   : > { %s3060_s22 = sld [smem:[#allocation13_spill]]  ;;  %s3061_s23 = sld [smem:[#allocation14_spill]] }
 0x5d6   : > { %s3062_s15 = smov %s2327_s16  ;;  %s3063_s16 = smov %s2331_s17 }
 0x5d7   : > { %s3064_s17 = smov %s2476_s10  ;;  %16 = sbr.rel (!%p14_p12) target bundleno = 6 (0x6), region = 82 }
 0x5de   :  { %1711 = vsyncpa [#allocation7], 1 }
 0x5df   :  { %1713 = vsyncpa [#allocation7 + $0x1], 1 }

</bundles_post_ra>
